<compile_context>
chip_gen: v7x
topology: tpu7x:2x2x1
jax: 0.10.0
libtpu: 0.0.40
codegen_flags: <defaults>
</compile_context>

<pallas_src>
import functools

import jax
import jax.numpy as jnp
from jax import lax
from jax.experimental import pallas as pl
from jax.experimental.pallas import tpu as pltpu

EPS = 1e-5


def _vmem_limit_bytes():
    """Generation-aware scoped-VMEM limit (~3/4 of physical per-core VMEM)."""
    try:
        cap = int(pltpu.get_tpu_info().vmem_capacity_bytes)
    except Exception:
        cap = 64 * 1024 * 1024  # conservative fallback (v7x-sized)
    return max(32 * 1024 * 1024, min(int(cap * 3 // 4), 112 * 1024 * 1024))


def _use_bf16_exp():
    """bf16 EUP exp on v6e/v7x; keep f32 exp on v5e and older (no bf16 EUP)."""
    try:
        kind = jax.devices()[0].device_kind.lower()
    except Exception:
        return False
    return not any(tag in kind for tag in ("v2", "v3", "v4", "v5"))


def _pick_tile(n, pref):
    """Largest tile <= pref that divides n and is a multiple of 128 (else full n)."""
    pref = max(128, (pref // 128) * 128)
    if n % 128 == 0:
        t = min(pref, n)
        while n % t != 0:
            t -= 128
        return t
    return n  # full extent (allowed when block dim == array dim)


def _select_tiles(nc, ns, cin, ckp, batch, nc_tile, ns_block, vmem_limit):
    """Pick (nc_t, ns_b) as big as the VMEM budget allows (v7x-safe)."""
    nc_t = _pick_tile(nc, nc_tile)
    ns_b = _pick_tile(ns, ns_block)

    def footprint(nt, sb):
        inter = 3 * nt * sb * 4                                # s_t / p_t / exp temps
        blocks = 2 * (ckp * nt * 4 + (ckp + 1) * sb * 2        # ck, G (double-buffered)
                      + (2 * cin + 1) * sb * 2                 # Hcat
                      + 2 * cin * nt * 4)                      # ct, out
        scratch = (2 * cin + 2) * nt * 4                       # acc + m
        return inter + blocks + scratch

    budget = int(0.6 * vmem_limit)
    while footprint(nc_t, ns_b) > budget:
        if ns_b % 256 == 0 and ns_b >= 256:
            ns_b //= 2
        elif nc_t % 256 == 0 and nc_t >= 256:
            nc_t //= 2
        else:
            break

    # Keep both v7x TensorCores fed via the parallel (batch, Nc-tile) axes.
    while batch * (nc // nc_t) < 2 and nc_t % 256 == 0 and nc_t >= 256:
        nc_t //= 2
    return nc_t, ns_b


def _style_proj_kernel(sk_ref, st_ref, waug_ref, baug_ref, wh_ref, bh_ref,
                       gp_ref, hcat_ref):
    """Style-side projections, hoisted out of the attention loop.

    sk: (Ck, Ns_b) f32, st: (Cin, Ns_b) f32 (channels-first, lane-dense).
    Outputs (both pixel-last, lane-dense):
      gp   (Ck+1, Ns_b) bf16 = W_aug @ sk + b_aug   (Wf and bf pre-folded)
      hcat (2Cin+1, Ns_b) bf16 = [H; H*H; 1]
    """
    sk = sk_ref[...].astype(jnp.bfloat16)
    st = st_ref[...].astype(jnp.bfloat16)

    g = jnp.dot(waug_ref[...], sk,
                preferred_element_type=jnp.float32) + baug_ref[...]
    gp_ref[...] = g.astype(gp_ref.dtype)

    h = jnp.dot(wh_ref[...], st,
                preferred_element_type=jnp.float32) + bh_ref[...]
    ones = jnp.ones((1, h.shape[1]), h.dtype)
    hcat_ref[...] = jnp.concatenate([h, h * h, ones], axis=0).astype(hcat_ref.dtype)


def _attn_adain_kernel(ck_ref, gp_ref, hcat_ref, ct_ref, cmean_ref, cinvstd_ref,
                       o_ref, m_ref, acc_ref, *, bf16_exp):
    """Flash-style attention AdaIN for one (batch, Nc-tile, Ns-block) grid step.

    ck: (Ck, Nc_t) f32, gp: (Ck+1, Ns_b) bf16, hcat: (2Cin+1, Ns_b) bf16,
    ct: (Cin, Nc_t), cmean/cinvstd: (Cin, 1) f32, out: (Cin, Nc_t).
    Scratch: m (1, Nc_t) f32, acc (2Cin+1, Nc_t) f32 = [P@H; P@H^2; sum P].
    """
    j = pl.program_id(2)

    @pl.when(j == 0)
    def _init():
        m_ref[...] = jnp.full_like(m_ref, -jnp.inf)
        acc_ref[...] = jnp.zeros_like(acc_ref)

    cin = ct_ref.shape[0]
    nc_t = ck_ref.shape[1]

    # Augment the content key with a ones row so gp's bias row contributes bf.G.
    ck = ck_ref[...].astype(jnp.bfloat16)                       # cast on the VPU
    ck_aug = jnp.concatenate(
        [ck, jnp.ones((1, nc_t), jnp.bfloat16)], axis=0)        # (Ck+1, Nc_t)

    # Scores, transposed: s_t[ns, nc] = sum_c gp[c, ns] * ck_aug[c, nc]
    # (contract the channel/sublane axis of both operands -> no transposes).
    s_t = lax.dot_general(gp_ref[...], ck_aug,
                          (((0,), (0,)), ((), ())),
                          preferred_element_type=jnp.float32)    # (Ns_b, Nc_t) f32

    # Online softmax over style pixels (sublane axis).
    m_prev = m_ref[...]
    m_new = jnp.maximum(m_prev, jnp.max(s_t, axis=0, keepdims=True))
    alpha = jnp.exp(m_prev - m_new)                              # (1, Nc_t) f32
    if bf16_exp:
        p_t = jnp.exp((s_t - m_new).astype(jnp.bfloat16))        # bf16 EUP (v6e/v7x)
    else:
        p_t = jnp.exp(s_t - m_new).astype(jnp.bfloat16)          # f32 EUP (v5e)

    # One MXU matmul against Hcat = [H; H*H; 1] accumulates P@H, P@H^2 and
    # the softmax denominator sum(P), all with f32 accumulation.
    acc_ref[...] = alpha * acc_ref[...] + jnp.dot(
        hcat_ref[...], p_t, preferred_element_type=jnp.float32)  # (2Cin+1, Nc_t)
    m_ref[...] = m_new

    @pl.when(j == pl.num_programs(2) - 1)
    def _finalize():
        acc = acc_ref[...]
        inv_l = 1.0 / acc[2 * cin:, :]            # exact; runs once per (b, i)
        mean = acc[:cin, :] * inv_l
        m2 = acc[cin:2 * cin, :] * inv_l
        std = jnp.sqrt(jnp.maximum(m2 - mean * mean, 0.0))
        # mean_variance_norm(content): stats precomputed over full Nc in the
        # wrapper (a per-tile reduction would be wrong once Nc is tiled).
        cnorm = (ct_ref[...] - cmean_ref[...]) * cinvstd_ref[...]
        o_ref[...] = (std * cnorm + mean).astype(o_ref.dtype)


def attn_adain(content, style, content_key, style_key,
               wf, bf, wg, bg, wh, bh, *, nc_tile=512, ns_block=2048):
    """content/style/content_key/style_key in NCHW; weights W:(Cout,Cin), b:(Cout,)."""
    b, cin, h, w = content.shape
    _, ckp, hs, ws = style_key.shape
    nc, ns = h * w, hs * ws

    vmem_limit = _vmem_limit_bytes()
    bf16_exp = _use_bf16_exp()
    nc_t, ns_b = _select_tiles(nc, ns, cin, ckp, b, nc_tile, ns_block, vmem_limit)

    # NCHW -> (b, C, Npix): pure reshapes; all f32->bf16 casts happen in-kernel.
    ct = content.reshape(b, cin, nc)
    st = style.reshape(b, cin, ns)
    ckey = content_key.reshape(b, ckp, nc)
    skey = style_key.reshape(b, ckp, ns)

    # Fold Wf / bf into the style-side projection (tiny wrapper-side matmuls):
    #   S[nc, ns] = (Wf ck + bf).(Wg sk + bg) = [ck; 1].(W_aug sk + b_aug)
    wf32 = wf.astype(jnp.float32)
    wg32 = wg.astype(jnp.float32)
    bf32 = bf.astype(jnp.float32)
    bg32 = bg.astype(jnp.float32)
    w_aug = jnp.concatenate([wf32.T @ wg32, (wg32.T @ bf32)[None, :]],
                            axis=0).astype(jnp.bfloat16)              # (Ck+1, Ck)
    b_aug = jnp.concatenate([wf32.T @ bg32, jnp.dot(bf32, bg32)[None]],
                            axis=0).reshape(ckp + 1, 1)                # (Ck+1, 1) f32
    wh_b = wh.astype(jnp.bfloat16)
    bh2 = bh.reshape(cin, 1).astype(jnp.float32)

    # Content instance-norm stats: full-pixel reduction, done once here.
    ctf = ct.astype(jnp.float32)
    cmean = jnp.mean(ctf, axis=2, keepdims=True)                       # (b, Cin, 1)
    cvar = jnp.var(ctf, axis=2, ddof=1, keepdims=True) + EPS
    cinvstd = lax.rsqrt(cvar)

    # ---- Prologue: style-side 1x1 convs (once per style pixel). ----
    gp, hcat = pl.pallas_call(
        _style_proj_kernel,
        out_shape=(jax.ShapeDtypeStruct((b, ckp + 1, ns), jnp.bfloat16),
                   jax.ShapeDtypeStruct((b, 2 * cin + 1, ns), jnp.bfloat16)),
        grid_spec=pltpu.PrefetchScalarGridSpec(
            num_scalar_prefetch=0,
            grid=(b, ns // ns_b),
            in_specs=[
                pl.BlockSpec((None, ckp, ns_b), lambda bi, j: (bi, 0, j)),
                pl.BlockSpec((None, cin, ns_b), lambda bi, j: (bi, 0, j)),
                pl.BlockSpec((ckp + 1, ckp), lambda bi, j: (0, 0)),
                pl.BlockSpec((ckp + 1, 1), lambda bi, j: (0, 0)),
                pl.BlockSpec((cin, cin), lambda bi, j: (0, 0)),
                pl.BlockSpec((cin, 1), lambda bi, j: (0, 0)),
            ],
            out_specs=[
                pl.BlockSpec((None, ckp + 1, ns_b), lambda bi, j: (bi, 0, j)),
                pl.BlockSpec((None, 2 * cin + 1, ns_b), lambda bi, j: (bi, 0, j)),
            ],
        ),
        compiler_params=pltpu.CompilerParams(
            dimension_semantics=("parallel", "parallel"),
            vmem_limit_bytes=vmem_limit),
    )(skey, st, w_aug, b_aug, wh_b, bh2)

    # ---- Main kernel: flash-style attention + AdaIN epilogue. ----
    out_flat = pl.pallas_call(
        functools.partial(_attn_adain_kernel, bf16_exp=bf16_exp),
        out_shape=jax.ShapeDtypeStruct((b, cin, nc), content.dtype),
        grid_spec=pltpu.PrefetchScalarGridSpec(
            num_scalar_prefetch=0,
            grid=(b, nc // nc_t, ns // ns_b),
            in_specs=[
                pl.BlockSpec((None, ckp, nc_t), lambda bi, i, j: (bi, 0, i)),
                pl.BlockSpec((None, ckp + 1, ns_b), lambda bi, i, j: (bi, 0, j)),
                pl.BlockSpec((None, 2 * cin + 1, ns_b), lambda bi, i, j: (bi, 0, j)),
                pl.BlockSpec((None, cin, nc_t), lambda bi, i, j: (bi, 0, i)),
                pl.BlockSpec((None, cin, 1), lambda bi, i, j: (bi, 0, 0)),
                pl.BlockSpec((None, cin, 1), lambda bi, i, j: (bi, 0, 0)),
            ],
            out_specs=pl.BlockSpec((None, cin, nc_t),
                                   lambda bi, i, j: (bi, 0, i)),
            scratch_shapes=[
                pltpu.VMEM((1, nc_t), jnp.float32),               # m (running max)
                pltpu.VMEM((2 * cin + 1, nc_t), jnp.float32),     # acc [PH; PH^2; sumP]
            ]),
        compiler_params=pltpu.CompilerParams(
            dimension_semantics=("parallel", "parallel", "arbitrary"),
            vmem_limit_bytes=vmem_limit),
    )(ckey, gp, hcat, ct, cmean, cinvstd)

    # (b, Cin, Nc) -> NCHW is a pure reshape (no transpose).
    return out_flat.reshape(b, cin, h, w)


def attn_adain_reference(content, style, content_key, style_key,
                         wf, bf, wg, bg, wh, bh):
    """Pure-JAX f32 reference mirroring the PyTorch forward (default-mask path)."""
    def conv1x1(x, wt, bias):
        return jnp.einsum('bchw,oc->bohw', x, wt) + bias[None, :, None, None]

    F = conv1x1(content_key, wf, bf)
    G = conv1x1(style_key, wg, bg)
    H = conv1x1(style, wh, bh)
    b, _, h, w = F.shape
    _, _, hs, ws = G.shape
    nc, ns = h * w, hs * ws
    Gf = G.reshape(b, -1, ns)
    style_flat = H.reshape(b, -1, ns).transpose(0, 2, 1)
    Ff = F.reshape(b, -1, nc).transpose(0, 2, 1)
    S = jnp.einsum('bnc,bcm->bnm', Ff, Gf)
    S = jax.nn.softmax(S, axis=-1)
    mean = jnp.einsum('bnm,bmc->bnc', S, style_flat)
    std = jnp.sqrt(jnp.maximum(
        jnp.einsum('bnm,bmc->bnc', S, style_flat ** 2) - mean ** 2, 0.0))
    mean = mean.reshape(b, h, w, -1).transpose(0, 3, 1, 2)
    std = std.reshape(b, h, w, -1).transpose(0, 3, 1, 2)

    cm = content.reshape(content.shape[0], content.shape[1], -1)
    cmean = cm.mean(axis=2)[:, :, None, None]
    cvar = cm.var(axis=2, ddof=1)[:, :, None, None] + EPS
    norm = (content - cmean) / jnp.sqrt(cvar)
    return std * norm + mean


if __name__ == "__main__":
    key = jax.random.PRNGKey(0)
    b = 2
    in_planes = 32
    key_planes = 32
    h = w = 16          # content spatial  -> Nc = 256
    hs = ws = 16        # style spatial    -> Ns = 256

    ks = jax.random.split(key, 10)
    content = jax.random.normal(ks[0], (b, in_planes, h, w), jnp.float32)
    style = jax.random.normal(ks[1], (b, in_planes, hs, ws), jnp.float32)
    content_key = jax.random.normal(ks[2], (b, key_planes, h, w), jnp.float32)
    style_key = jax.random.normal(ks[3], (b, key_planes, hs, ws), jnp.float32)

    scale = 0.1
    wf = scale * jax.random.normal(ks[4], (key_planes, key_planes), jnp.float32)
    bf = scale * jax.random.normal(ks[5], (key_planes,), jnp.float32)
    wg = scale * jax.random.normal(ks[6], (key_planes, key_planes), jnp.float32)
    bg = scale * jax.random.normal(ks[7], (key_planes,), jnp.float32)
    wh = scale * jax.random.normal(ks[8], (in_planes, in_planes), jnp.float32)
    bh = scale * jax.random.normal(ks[9], (in_planes,), jnp.float32)

    # Small tiles so the toy problem exercises the multi-tile flash loop
    # (grid = (2, 2, 2)); production defaults are nc_tile=512 / ns_block=2048.
    run = jax.jit(functools.partial(attn_adain, nc_tile=128, ns_block=128))
    out = run(content, style, content_key, style_key, wf, bf, wg, bg, wh, bh)
    out = jax.block_until_ready(out)

    ref = attn_adain_reference(content, style, content_key, style_key,
                               wf, bf, wg, bg, wh, bh)
    assert out.shape == (b, in_planes, h, w)
    max_err = float(jnp.max(jnp.abs(out - ref)))
    mean_err = float(jnp.mean(jnp.abs(out - ref)))
    # bf16 MXU operands vs. an f32 reference: tight mean check, loose max check.
    assert mean_err < 2.5e-2 and bool(jnp.allclose(out, ref, atol=1e-1, rtol=1e-1)), \
        f"max abs err {max_err}, mean abs err {mean_err}"
    print("KERNEL_OK")
</pallas_src>

<mosaic_0001>
module attributes {stable_mosaic.version = 11 : i64} {
  func.func @_style_proj_kernel(%arg0: i32, %arg1: i32, %arg2: memref<1x32x128xf32, #tpu.memory_space<vmem>>, %arg3: memref<1x32x128xf32, #tpu.memory_space<vmem>>, %arg4: memref<33x32xbf16, #tpu.memory_space<vmem>>, %arg5: memref<33x1xf32, #tpu.memory_space<vmem>>, %arg6: memref<32x32xbf16, #tpu.memory_space<vmem>>, %arg7: memref<32x1xf32, #tpu.memory_space<vmem>>, %arg8: memref<1x33x128xbf16, #tpu.memory_space<vmem>>, %arg9: memref<1x65x128xbf16, #tpu.memory_space<vmem>>) attributes {dimension_semantics = [#tpu.dimension_semantics<parallel>, #tpu.dimension_semantics<parallel>], iteration_bounds = array<i64: 2, 2>, scalar_prefetch = 0 : i64, scratch_operands = 0 : i64, tpu.core_type = #tpu.core_type<tc>, window_params = [{transform_indices = @transform_0, window_bounds = array<i64: 1, 32, 128>}, {transform_indices = @transform_1, window_bounds = array<i64: 1, 32, 128>}, {pipeline_mode = #tpu.pipeline_mode<synchronous>, transform_indices = @transform_2, window_bounds = array<i64: 33, 32>}, {pipeline_mode = #tpu.pipeline_mode<synchronous>, transform_indices = @transform_3, window_bounds = array<i64: 33, 1>}, {pipeline_mode = #tpu.pipeline_mode<synchronous>, transform_indices = @transform_4, window_bounds = array<i64: 32, 32>}, {pipeline_mode = #tpu.pipeline_mode<synchronous>, transform_indices = @transform_5, window_bounds = array<i64: 32, 1>}, {transform_indices = @transform_6, window_bounds = array<i64: 1, 33, 128>}, {transform_indices = @transform_7, window_bounds = array<i64: 1, 65, 128>}]} {
    %c0 = arith.constant 0 : index
    %c0_0 = arith.constant 0 : index
    %c0_1 = arith.constant 0 : index
    %0 = vector.load %arg2[%c0, %c0_0, %c0_1] : memref<1x32x128xf32, #tpu.memory_space<vmem>>, vector<1x32x128xf32>
    %1 = vector.shape_cast %0 : vector<1x32x128xf32> to vector<32x128xf32>
    %2 = arith.truncf %1 : vector<32x128xf32> to vector<32x128xbf16>
    %c0_2 = arith.constant 0 : index
    %c0_3 = arith.constant 0 : index
    %c0_4 = arith.constant 0 : index
    %3 = vector.load %arg3[%c0_2, %c0_3, %c0_4] : memref<1x32x128xf32, #tpu.memory_space<vmem>>, vector<1x32x128xf32>
    %4 = vector.shape_cast %3 : vector<1x32x128xf32> to vector<32x128xf32>
    %5 = arith.truncf %4 : vector<32x128xf32> to vector<32x128xbf16>
    %c0_5 = arith.constant 0 : index
    %c0_6 = arith.constant 0 : index
    %6 = vector.load %arg4[%c0_5, %c0_6] : memref<33x32xbf16, #tpu.memory_space<vmem>>, vector<33x32xbf16>
    %cst = arith.constant dense<0.000000e+00> : vector<33x128xf32>
    %7 = tpu.matmul %6, %2, %cst {dimension_numbers = #tpu.dot_dimension_numbers<[1], [0], [0], [1], [0, 0, 1, 1], [], []>} : vector<33x32xbf16>, vector<32x128xbf16>, vector<33x128xf32> -> vector<33x128xf32>
    %c0_7 = arith.constant 0 : index
    %c0_8 = arith.constant 0 : index
    %8 = vector.load %arg5[%c0_7, %c0_8] : memref<33x1xf32, #tpu.memory_space<vmem>>, vector<33x1xf32>
    %9 = vector.broadcast %8 : vector<33x1xf32> to vector<33x128xf32>
    %10 = arith.addf %7, %9 : vector<33x128xf32>
    %11 = arith.truncf %10 : vector<33x128xf32> to vector<33x128xbf16>
    %c0_9 = arith.constant 0 : index
    %c0_10 = arith.constant 0 : index
    %c0_11 = arith.constant 0 : index
    %12 = vector.load %arg8[%c0_9, %c0_10, %c0_11] : memref<1x33x128xbf16, #tpu.memory_space<vmem>>, vector<1x33x128xbf16>
    %13 = vector.shape_cast %12 : vector<1x33x128xbf16> to vector<33x128xbf16>
    %14 = vector.shape_cast %11 : vector<33x128xbf16> to vector<1x33x128xbf16>
    tpu.vector_store %arg8[%c0_9, %c0_10, %c0_11], %14 {strides = array<i32>} : memref<1x33x128xbf16, #tpu.memory_space<vmem>>, vector<1x33x128xbf16>,
    %c0_12 = arith.constant 0 : index
    %c0_13 = arith.constant 0 : index
    %15 = vector.load %arg6[%c0_12, %c0_13] : memref<32x32xbf16, #tpu.memory_space<vmem>>, vector<32x32xbf16>
    %cst_14 = arith.constant dense<0.000000e+00> : vector<32x128xf32>
    %16 = tpu.matmul %15, %5, %cst_14 {dimension_numbers = #tpu.dot_dimension_numbers<[1], [0], [0], [1], [0, 0, 1, 1], [], []>} : vector<32x32xbf16>, vector<32x128xbf16>, vector<32x128xf32> -> vector<32x128xf32>
    %c0_15 = arith.constant 0 : index
    %c0_16 = arith.constant 0 : index
    %17 = vector.load %arg7[%c0_15, %c0_16] : memref<32x1xf32, #tpu.memory_space<vmem>>, vector<32x1xf32>
    %18 = vector.broadcast %17 : vector<32x1xf32> to vector<32x128xf32>
    %19 = arith.addf %16, %18 : vector<32x128xf32>
    %cst_17 = arith.constant 1.000000e+00 : f32
    %20 = vector.broadcast %cst_17 : f32 to vector<1x128xf32>
    %21 = arith.mulf %19, %19 : vector<32x128xf32>
    %22 = tpu.concatenate %19, %21, %20 in 0 : vector<32x128xf32>, vector<32x128xf32>, vector<1x128xf32> -> vector<65x128xf32>
    %23 = arith.truncf %22 : vector<65x128xf32> to vector<65x128xbf16>
    %c0_18 = arith.constant 0 : index
    %c0_19 = arith.constant 0 : index
    %c0_20 = arith.constant 0 : index
    %24 = vector.load %arg9[%c0_18, %c0_19, %c0_20] : memref<1x65x128xbf16, #tpu.memory_space<vmem>>, vector<1x65x128xbf16>
    %25 = vector.shape_cast %24 : vector<1x65x128xbf16> to vector<65x128xbf16>
    %26 = vector.shape_cast %23 : vector<65x128xbf16> to vector<1x65x128xbf16>
    tpu.vector_store %arg9[%c0_18, %c0_19, %c0_20], %26 {strides = array<i32>} : memref<1x65x128xbf16, #tpu.memory_space<vmem>>, vector<1x65x128xbf16>,
    return
  }
  func.func @transform_0(%arg0: i32, %arg1: i32) -> (i32, i32, i32) {
    %c0_i32 = arith.constant 0 : i32
    %c0_i32_0 = arith.constant 0 : i32
    return %arg0, %c0_i32, %arg1 : i32, i32, i32
  }
  func.func @transform_1(%arg0: i32, %arg1: i32) -> (i32, i32, i32) {
    %c0_i32 = arith.constant 0 : i32
    %c0_i32_0 = arith.constant 0 : i32
    return %arg0, %c0_i32, %arg1 : i32, i32, i32
  }
  func.func @transform_2(%arg0: i32, %arg1: i32) -> (i32, i32) {
    %c0_i32 = arith.constant 0 : i32
    %c0_i32_0 = arith.constant 0 : i32
    %c0_i32_1 = arith.constant 0 : i32
    return %c0_i32, %c0_i32_0 : i32, i32
  }
  func.func @transform_3(%arg0: i32, %arg1: i32) -> (i32, i32) {
    %c0_i32 = arith.constant 0 : i32
    %c0_i32_0 = arith.constant 0 : i32
    %c0_i32_1 = arith.constant 0 : i32
    return %c0_i32, %c0_i32_0 : i32, i32
  }
  func.func @transform_4(%arg0: i32, %arg1: i32) -> (i32, i32) {
    %c0_i32 = arith.constant 0 : i32
    %c0_i32_0 = arith.constant 0 : i32
    %c0_i32_1 = arith.constant 0 : i32
    return %c0_i32, %c0_i32_0 : i32, i32
  }
  func.func @transform_5(%arg0: i32, %arg1: i32) -> (i32, i32) {
    %c0_i32 = arith.constant 0 : i32
    %c0_i32_0 = arith.constant 0 : i32
    %c0_i32_1 = arith.constant 0 : i32
    return %c0_i32, %c0_i32_0 : i32, i32
  }
  func.func @transform_6(%arg0: i32, %arg1: i32) -> (i32, i32, i32) {
    %c0_i32 = arith.constant 0 : i32
    %c0_i32_0 = arith.constant 0 : i32
    return %arg0, %c0_i32, %arg1 : i32, i32, i32
  }
  func.func @transform_7(%arg0: i32, %arg1: i32) -> (i32, i32, i32) {
    %c0_i32 = arith.constant 0 : i32
    %c0_i32_0 = arith.constant 0 : i32
    return %arg0, %c0_i32, %arg1 : i32, i32, i32
  }
}

module attributes {stable_mosaic.version = 11 : i64} {
  func.func @_attn_adain_kernel(%arg0: i32, %arg1: i32, %arg2: i32, %arg3: memref<1x32x128xf32, #tpu.memory_space<vmem>>, %arg4: memref<1x33x128xbf16, #tpu.memory_space<vmem>>, %arg5: memref<1x65x128xbf16, #tpu.memory_space<vmem>>, %arg6: memref<1x32x128xf32, #tpu.memory_space<vmem>>, %arg7: memref<1x32x1xf32, #tpu.memory_space<vmem>>, %arg8: memref<1x32x1xf32, #tpu.memory_space<vmem>>, %arg9: memref<1x32x128xf32, #tpu.memory_space<vmem>>, %arg10: memref<1x128xf32, #tpu.memory_space<vmem>>, %arg11: memref<65x128xf32, #tpu.memory_space<vmem>>) attributes {dimension_semantics = [#tpu.dimension_semantics<parallel>, #tpu.dimension_semantics<parallel>, #tpu.dimension_semantics<arbitrary>], iteration_bounds = array<i64: 2, 2, 2>, scalar_prefetch = 0 : i64, scratch_operands = 2 : i64, tpu.core_type = #tpu.core_type<tc>, window_params = [{transform_indices = @transform_0, window_bounds = array<i64: 1, 32, 128>}, {transform_indices = @transform_1, window_bounds = array<i64: 1, 33, 128>}, {transform_indices = @transform_2, window_bounds = array<i64: 1, 65, 128>}, {transform_indices = @transform_3, window_bounds = array<i64: 1, 32, 128>}, {transform_indices = @transform_4, window_bounds = array<i64: 1, 32, 1>}, {transform_indices = @transform_5, window_bounds = array<i64: 1, 32, 1>}, {transform_indices = @transform_6, window_bounds = array<i64: 1, 32, 128>}]} {
    %c0_i32 = arith.constant 0 : i32
    %0 = arith.cmpi eq, %arg2, %c0_i32 : i32
    %1 = arith.extui %0 : i1 to i32
    %c0_i32_0 = arith.constant 0 : i32
    %2 = arith.cmpi ne, %1, %c0_i32_0 : i32
    scf.if %2 {
      %cst_21 = arith.constant 0xFF800000 : f32
      %33 = vector.broadcast %cst_21 : f32 to vector<1x128xf32>
      %c0_22 = arith.constant 0 : index
      %c0_23 = arith.constant 0 : index
      %34 = vector.load %arg10[%c0_22, %c0_23] : memref<1x128xf32, #tpu.memory_space<vmem>>, vector<1x128xf32>
      tpu.vector_store %arg10[%c0_22, %c0_23], %33 {strides = array<i32>} : memref<1x128xf32, #tpu.memory_space<vmem>>, vector<1x128xf32>,
      %cst_24 = arith.constant 0.000000e+00 : f32
      %35 = vector.broadcast %cst_24 : f32 to vector<65x128xf32>
      %c0_25 = arith.constant 0 : index
      %c0_26 = arith.constant 0 : index
      %36 = vector.load %arg11[%c0_25, %c0_26] : memref<65x128xf32, #tpu.memory_space<vmem>>, vector<65x128xf32>
      tpu.vector_store %arg11[%c0_25, %c0_26], %35 {strides = array<i32>} : memref<65x128xf32, #tpu.memory_space<vmem>>, vector<65x128xf32>,
    } else {
    }
    %c0 = arith.constant 0 : index
    %c0_1 = arith.constant 0 : index
    %c0_2 = arith.constant 0 : index
    %3 = vector.load %arg3[%c0, %c0_1, %c0_2] : memref<1x32x128xf32, #tpu.memory_space<vmem>>, vector<1x32x128xf32>
    %4 = vector.shape_cast %3 : vector<1x32x128xf32> to vector<32x128xf32>
    %5 = arith.truncf %4 : vector<32x128xf32> to vector<32x128xbf16>
    %cst = arith.constant 1.000000e+00 : bf16
    %6 = vector.broadcast %cst : bf16 to vector<1x128xbf16>
    %7 = tpu.concatenate %5, %6 in 0 : vector<32x128xbf16>, vector<1x128xbf16> -> vector<33x128xbf16>
    %c0_3 = arith.constant 0 : index
    %c0_4 = arith.constant 0 : index
    %c0_5 = arith.constant 0 : index
    %8 = vector.load %arg4[%c0_3, %c0_4, %c0_5] : memref<1x33x128xbf16, #tpu.memory_space<vmem>>, vector<1x33x128xbf16>
    %9 = vector.shape_cast %8 : vector<1x33x128xbf16> to vector<33x128xbf16>
    %cst_6 = arith.constant dense<0.000000e+00> : vector<128x128xf32>
    %10 = tpu.matmul %9, %7, %cst_6 {dimension_numbers = #tpu.dot_dimension_numbers<[0], [0], [1], [1], [0, 1, 1, 1], [], []>} : vector<33x128xbf16>, vector<33x128xbf16>, vector<128x128xf32> -> vector<128x128xf32>
    %c0_7 = arith.constant 0 : index
    %c0_8 = arith.constant 0 : index
    %11 = vector.load %arg10[%c0_7, %c0_8] : memref<1x128xf32, #tpu.memory_space<vmem>>, vector<1x128xf32>
    %cst_9 = arith.constant dense<0xFF800000> : vector<128xf32>
    %12 = vector.multi_reduction <maximumf>, %10, %cst_9 [0] : vector<128x128xf32> to vector<128xf32>
    %13 = vector.shape_cast %12 : vector<128xf32> to vector<1x128xf32>
    %14 = arith.maximumf %11, %13 : vector<1x128xf32>
    %15 = arith.subf %11, %14 : vector<1x128xf32>
    %16 = math.exp %15 : vector<1x128xf32>
    %17 = vector.broadcast %14 : vector<1x128xf32> to vector<128x128xf32>
    %18 = arith.subf %10, %17 : vector<128x128xf32>
    %19 = arith.truncf %18 : vector<128x128xf32> to vector<128x128xbf16>
    %20 = math.exp %19 : vector<128x128xbf16>
    %c0_10 = arith.constant 0 : index
    %c0_11 = arith.constant 0 : index
    %21 = vector.load %arg11[%c0_10, %c0_11] : memref<65x128xf32, #tpu.memory_space<vmem>>, vector<65x128xf32>
    %22 = vector.broadcast %16 : vector<1x128xf32> to vector<65x128xf32>
    %23 = arith.mulf %22, %21 : vector<65x128xf32>
    %c0_12 = arith.constant 0 : index
    %c0_13 = arith.constant 0 : index
    %c0_14 = arith.constant 0 : index
    %24 = vector.load %arg5[%c0_12, %c0_13, %c0_14] : memref<1x65x128xbf16, #tpu.memory_space<vmem>>, vector<1x65x128xbf16>
    %25 = vector.shape_cast %24 : vector<1x65x128xbf16> to vector<65x128xbf16>
    %cst_15 = arith.constant dense<0.000000e+00> : vector<65x128xf32>
    %26 = tpu.matmul %25, %20, %cst_15 {dimension_numbers = #tpu.dot_dimension_numbers<[1], [0], [0], [1], [0, 0, 1, 1], [], []>} : vector<65x128xbf16>, vector<128x128xbf16>, vector<65x128xf32> -> vector<65x128xf32>
    %27 = arith.addf %23, %26 : vector<65x128xf32>
    %c0_16 = arith.constant 0 : index
    %c0_17 = arith.constant 0 : index
    %28 = vector.load %arg11[%c0_16, %c0_17] : memref<65x128xf32, #tpu.memory_space<vmem>>, vector<65x128xf32>
    tpu.vector_store %arg11[%c0_16, %c0_17], %27 {strides = array<i32>} : memref<65x128xf32, #tpu.memory_space<vmem>>, vector<65x128xf32>,
    %c0_18 = arith.constant 0 : index
    %c0_19 = arith.constant 0 : index
    %29 = vector.load %arg10[%c0_18, %c0_19] : memref<1x128xf32, #tpu.memory_space<vmem>>, vector<1x128xf32>
    tpu.vector_store %arg10[%c0_18, %c0_19], %14 {strides = array<i32>} : memref<1x128xf32, #tpu.memory_space<vmem>>, vector<1x128xf32>,
    %c1_i32 = arith.constant 1 : i32
    %30 = arith.cmpi eq, %arg2, %c1_i32 : i32
    %31 = arith.extui %30 : i1 to i32
    %c0_i32_20 = arith.constant 0 : i32
    %32 = arith.cmpi ne, %31, %c0_i32_20 : i32
    scf.if %32 {
      %c0_21 = arith.constant 0 : index
      %c0_22 = arith.constant 0 : index
      %33 = vector.load %arg11[%c0_21, %c0_22] : memref<65x128xf32, #tpu.memory_space<vmem>>, vector<65x128xf32>
      %34 = vector.extract_strided_slice %33 {offsets = [64, 0], sizes = [1, 128], strides = [1, 1]} : vector<65x128xf32> to vector<1x128xf32>
      %cst_23 = arith.constant 1.000000e+00 : f32
      %35 = vector.broadcast %cst_23 : f32 to vector<1x128xf32>
      %36 = arith.divf %35, %34 : vector<1x128xf32>
      %37 = vector.extract_strided_slice %33 {offsets = [0, 0], sizes = [32, 128], strides = [1, 1]} : vector<65x128xf32> to vector<32x128xf32>
      %38 = vector.broadcast %36 : vector<1x128xf32> to vector<32x128xf32>
      %39 = arith.mulf %37, %38 : vector<32x128xf32>
      %40 = vector.extract_strided_slice %33 {offsets = [32, 0], sizes = [32, 128], strides = [1, 1]} : vector<65x128xf32> to vector<32x128xf32>
      %41 = vector.broadcast %36 : vector<1x128xf32> to vector<32x128xf32>
      %42 = arith.mulf %40, %41 : vector<32x128xf32>
      %43 = arith.mulf %39, %39 : vector<32x128xf32>
      %44 = arith.subf %42, %43 : vector<32x128xf32>
      %cst_24 = arith.constant 0.000000e+00 : f32
      %45 = vector.broadcast %cst_24 : f32 to vector<32x128xf32>
      %46 = arith.maximumf %44, %45 : vector<32x128xf32>
      %47 = math.sqrt %46 : vector<32x128xf32>
      %c0_25 = arith.constant 0 : index
      %c0_26 = arith.constant 0 : index
      %c0_27 = arith.constant 0 : index
      %48 = vector.load %arg6[%c0_25, %c0_26, %c0_27] : memref<1x32x128xf32, #tpu.memory_space<vmem>>, vector<1x32x128xf32>
      %49 = vector.shape_cast %48 : vector<1x32x128xf32> to vector<32x128xf32>
      %c0_28 = arith.constant 0 : index
      %c0_29 = arith.constant 0 : index
      %c0_30 = arith.constant 0 : index
      %50 = vector.load %arg7[%c0_28, %c0_29, %c0_30] : memref<1x32x1xf32, #tpu.memory_space<vmem>>, vector<1x32x1xf32>
      %51 = vector.shape_cast %50 : vector<1x32x1xf32> to vector<32x1xf32>
      %52 = vector.broadcast %51 : vector<32x1xf32> to vector<32x128xf32>
      %53 = arith.subf %49, %52 : vector<32x128xf32>
      %c0_31 = arith.constant 0 : index
      %c0_32 = arith.constant 0 : index
      %c0_33 = arith.constant 0 : index
      %54 = vector.load %arg8[%c0_31, %c0_32, %c0_33] : memref<1x32x1xf32, #tpu.memory_space<vmem>>, vector<1x32x1xf32>
      %55 = vector.shape_cast %54 : vector<1x32x1xf32> to vector<32x1xf32>
      %56 = vector.broadcast %55 : vector<32x1xf32> to vector<32x128xf32>
      %57 = arith.mulf %53, %56 : vector<32x128xf32>
      %58 = arith.mulf %47, %57 : vector<32x128xf32>
      %59 = arith.addf %58, %39 : vector<32x128xf32>
      %c0_34 = arith.constant 0 : index
      %c0_35 = arith.constant 0 : index
      %c0_36 = arith.constant 0 : index
      %60 = vector.load %arg9[%c0_34, %c0_35, %c0_36] : memref<1x32x128xf32, #tpu.memory_space<vmem>>, vector<1x32x128xf32>
      %61 = vector.shape_cast %60 : vector<1x32x128xf32> to vector<32x128xf32>
      %62 = vector.shape_cast %59 : vector<32x128xf32> to vector<1x32x128xf32>
      tpu.vector_store %arg9[%c0_34, %c0_35, %c0_36], %62 {strides = array<i32>} : memref<1x32x128xf32, #tpu.memory_space<vmem>>, vector<1x32x128xf32>,
    } else {
    }
    return
  }
  func.func @transform_0(%arg0: i32, %arg1: i32, %arg2: i32) -> (i32, i32, i32) {
    %c0_i32 = arith.constant 0 : i32
    %c0_i32_0 = arith.constant 0 : i32
    return %arg0, %c0_i32, %arg1 : i32, i32, i32
  }
  func.func @transform_1(%arg0: i32, %arg1: i32, %arg2: i32) -> (i32, i32, i32) {
    %c0_i32 = arith.constant 0 : i32
    %c0_i32_0 = arith.constant 0 : i32
    return %arg0, %c0_i32, %arg2 : i32, i32, i32
  }
  func.func @transform_2(%arg0: i32, %arg1: i32, %arg2: i32) -> (i32, i32, i32) {
    %c0_i32 = arith.constant 0 : i32
    %c0_i32_0 = arith.constant 0 : i32
    return %arg0, %c0_i32, %arg2 : i32, i32, i32
  }
  func.func @transform_3(%arg0: i32, %arg1: i32, %arg2: i32) -> (i32, i32, i32) {
    %c0_i32 = arith.constant 0 : i32
    %c0_i32_0 = arith.constant 0 : i32
    return %arg0, %c0_i32, %arg1 : i32, i32, i32
  }
  func.func @transform_4(%arg0: i32, %arg1: i32, %arg2: i32) -> (i32, i32, i32) {
    %c0_i32 = arith.constant 0 : i32
    %c0_i32_0 = arith.constant 0 : i32
    %c0_i32_1 = arith.constant 0 : i32
    return %arg0, %c0_i32, %c0_i32_0 : i32, i32, i32
  }
  func.func @transform_5(%arg0: i32, %arg1: i32, %arg2: i32) -> (i32, i32, i32) {
    %c0_i32 = arith.constant 0 : i32
    %c0_i32_0 = arith.constant 0 : i32
    %c0_i32_1 = arith.constant 0 : i32
    return %arg0, %c0_i32, %c0_i32_0 : i32, i32, i32
  }
  func.func @transform_6(%arg0: i32, %arg1: i32, %arg2: i32) -> (i32, i32, i32) {
    %c0_i32 = arith.constant 0 : i32
    %c0_i32_0 = arith.constant 0 : i32
    return %arg0, %c0_i32, %arg1 : i32, i32, i32
  }
}

</mosaic_0001>

<bundles_post_ra>
// kernel: attn_adain.2
= control target key start
LH: loop header
LB: loop body
LE: loop exit
PB: predicated region body
PF: predicated region fallthrough
CT: control target
= control target key end

     0   :  { %s1285_s24 = smov 0   ;;  %s1287_s25 = smov 0   ;;  %s1493_s0 = inlined_call_operand.vmem [shape: f32[2,32,256], index: 0, kind: input, shape index: {}]   ;;  %s1494_s1 = inlined_call_operand.vmem [shape: f32[2,32,256], index: 1, kind: input, shape index: {}]   ;;  %s1495_s2 = inlined_call_operand.vmem [shape: bf16[33,32], index: 2, kind: input, shape index: {}]   ;;  %s1496_s3 = inlined_call_operand.vmem [shape: f32[33,1], index: 3, kind: input, shape index: {}]   ;;  %s1497_s4 = inlined_call_operand.vmem [shape: bf16[32,32], index: 4, kind: input, shape index: {}]   ;;  %s1498_s5 = inlined_call_operand.vmem [shape: f32[32,1], index: 5, kind: input, shape index: {}]   ;;  %s1499_s6 = inlined_call_operand.vmem [shape: bf16[2,33,256], index: 6, kind: output, shape index: {0}]   ;;  %s1500_s7 = inlined_call_operand.vmem [shape: bf16[2,65,256], index: 7, kind: output, shape index: {1}]  }
   0x1   :  { %s1289_s26 = smov 0   ;;  %s1291_s27 = smov 0  }
   0x2   :  { %s1293_s28 = smov 0   ;;  %s1295_s29 = smov 0  }
   0x3   :  { %s1297_s30 = smov 0  }
   0x4 LB: > { %s27_s8 = sadd.s32 1, %s1231_s28  ;;  %s30_s9 = sadd.s32 1, %s1235_s29  ;;  %s1239_s30 = sphi %s1297_s30, %s18_s30   ;;  %s1235_s29 = sphi %s1295_s29, %s1510_s29   ;;  %s1231_s28 = sphi %s1293_s28, %s1509_s28   ;;  %s1227_s27 = sphi %s1291_s27, %s1508_s27   ;;  %s1223_s26 = sphi %s1289_s26, %s1507_s26   ;;  %s1219_s25 = sphi %s1287_s25, %s1506_s25   ;;  %s1215_s24 = sphi %s1285_s24, %s1505_s24  }
   0x5   : > { %p28_p0 = scmp.ge.s32.totalorder %s27_s8, 2  ;;  %s989_s10 = sadd.s32 4294967295, %s1239_s30  }
   0x6   : > { %p46_p1 = scmp.ne.s32.totalorder %s1219_s25, %s1215_s24  ;;  %p47_p2 = scmp.eq.s32.totalorder %s1239_s30, 0 }
   0x7   : > { %s1512_s8 = smov (%p28_p0, %s27_s8), 0  ;;  %s1514_s9 = smov (!%p28_p0, %s30_s9), %s1235_s29 }
   0x8   : > { %p32_p3 = scmp.ge.s32.totalorder %s1514_s9, 2  ;;  %p190_p4 = scmp.eq.s32.totalorder %s989_s10, 3 }
   0x9   : > { %s35_s11 = ssub.s32 %s1231_s28, %s1512_s8  ;;  %p1331_p5 = por %p47_p2, %p46_p1 }
   0xa   : > { %s1516_s9 = smov (%p32_p3, %s1514_s9), 0  ;;  %p1337_p6 = por %p190_p4, %p46_p1 }
   0xb   : > { %s34_s14 = ssub.s32 %s1235_s29, %s1516_s9  ;;  %s39_s16 = sadd.s32 1, %s1219_s25 }
   0xc   : > { %s36_s15 = sor.u32 %s35_s11, %s34_s14  ;;  %p992_p8 = scmp.ge.s32.totalorder %s1239_s30, 4 }
   0xd   : > { %p37_p7 = scmp.eq.s32.totalorder %s36_s15, 0 }
   0xe   : > { %252 = sbr.rel (%p992_p8) target bundleno = 37 (0x25), region = 32 }
   0xf   : > { %s1345_s17 = scalar_select %p37_p7, %s1219_s25, %s39_s16  }
  0x15   : > { %255 = sbr.rel (!%p1331_p5) target bundleno = 29 (0x1d), region = 36  ;;  %s257_s18 = sand.u32 (%p1331_p5), 1, %s1219_s25  }
  0x16   : > { %s994_s19 = sshll.u32 (%p1331_p5), %s1235_s29, 3  ;;  %s993_s20 = sshll.u32 (%p1331_p5), %s257_s18, 5 }
  0x17   : > { %s261_s21 = sadd.s32 (%p1331_p5), %s1231_s28, %s994_s19  ;;  %s259_s14 = scalar_lea.vmem (%p1331_p5), [#allocation2], %s993_s20 }
  0x18   : > { %s995_s22 = sshll.u32 (%p1331_p5), %s261_s21, 3 }
  0x19   : > { %s263_s11 = scalar_lea.vmem (%p1331_p5), %s1493_s0, %s995_s22 }
  0x1a   : > { %v297_v0 = vld [vmem:[%s263_s11] sm:$0xff] (%p1331_p5)  ;;  %v299_v1 = vld [vmem:[%s263_s11 + $0x10] sm:$0xff] (%p1331_p5) }
  0x1b   : > { %v301_v2 = vld [vmem:[%s263_s11 + $0x20] sm:$0xff] (%p1331_p5)  ;;  %298 = vst [vmem:[%s259_s14] sm:$0xff] (%p1331_p5), %v297_v0  ;;  %300 = vst [vmem:[%s259_s14 + $0x8] sm:$0xff] (%p1331_p5), %v299_v1  ;;  %v303_v3 = vld [vmem:[%s263_s11 + $0x30] sm:$0xff] (%p1331_p5) }
  0x1c   : > { %302 = vst [vmem:[%s259_s14 + $0x10] sm:$0xff] %v301_v2  ;;  %304 = vst [vmem:[%s259_s14 + $0x18] sm:$0xff] %v303_v3 }
  0x1d PF: > { %310 = sbr.rel (!%p1331_p5) target bundleno = 37 (0x25), region = 74  ;;  %s312_s15 = sand.u32 (%p1331_p5), 1, %s1219_s25  }
  0x1e   : > { %s997_s16 = sshll.u32 (%p1331_p5), %s1235_s29, 3  ;;  %s996_s18 = sshll.u32 (%p1331_p5), %s312_s15, 5 }
  0x1f   : > { %s316_s19 = sadd.s32 (%p1331_p5), %s1231_s28, %s997_s16  ;;  %s314_s10 = scalar_lea.vmem (%p1331_p5), [#allocation3], %s996_s18 }
  0x20   : > { %s998_s21 = sshll.u32 (%p1331_p5), %s316_s19, 3 }
  0x21   : > { %s318_s20 = scalar_lea.vmem (%p1331_p5), %s1494_s1, %s998_s21 }
  0x22   : > { %v352_v4 = vld [vmem:[%s318_s20] sm:$0xff] (%p1331_p5)  ;;  %v354_v5 = vld [vmem:[%s318_s20 + $0x10] sm:$0xff] (%p1331_p5) }
  0x23   : > { %v356_v6 = vld [vmem:[%s318_s20 + $0x20] sm:$0xff] (%p1331_p5)  ;;  %353 = vst [vmem:[%s314_s10] sm:$0xff] (%p1331_p5), %v352_v4  ;;  %355 = vst [vmem:[%s314_s10 + $0x8] sm:$0xff] (%p1331_p5), %v354_v5  ;;  %v358_v7 = vld [vmem:[%s318_s20 + $0x30] sm:$0xff] (%p1331_p5) }
  0x24   : > { %357 = vst [vmem:[%s314_s10 + $0x10] sm:$0xff] %v356_v6  ;;  %359 = vst [vmem:[%s314_s10 + $0x18] sm:$0xff] %v358_v7 }
  0x25 PF: > { %p999_p9 = scmp.ge.s32.totalorder %s1239_s30, 1  ;;  %p364_p10 = scmp.lt.s32.totalorder %s1239_s30, 5 }
  0x27   : > { %p365_p11 = pnand %p999_p9, %p364_p10 }
  0x28   : > { %s1367_s12 = sand.u32 (!%p365_p11), 1, %s1215_s24   ;;  %v1241_v8 = vmov (!%p365_p11), 0.0   ;;  %vm1242_vm0 = vmmov (!%p365_p11), 0   ;;  %v1243_v15 = vmov (!%p365_p11), 0   ;;  %v578_v21 = vld [vmem:[%s1498_s5] sm:$0xff] (!%p365_p11)  ;;  %v580_v24 = vld [vmem:[%s1498_s5 + $0x10] sm:$0xff] (!%p365_p11) }
  0x29   : > { %368 = sbr.rel (%p365_p11) target bundleno = 299 (0x12b), region = 112  ;;  %1086 = vmatprep.subr.bf16.mxu0 (!%p365_p11), %v1241_v8  ;;  %1110 = vmatprep.subr.bf16.mxu1 (!%p365_p11), %v1241_v8  ;;  %s1000_s11 = sshll.u32 (!%p365_p11), %s1367_s12, 5  ;;  %v1180_v22 = vld [vmem:[%s1495_s2] sm:$0xff] (!%p365_p11)   ;;  %v1181_v23 = vld [vmem:[%s1495_s2 + $0x10] ss:$0 sps:$4 sm:$0x11] (!%p365_p11)  }
  0x2a   : > { %1090 = vmatprep.mubr.msk.bf16.mxu0 (!%p365_p11), %vm1242_vm0, %v1241_v8  ;;  %1098 = vmatprep.mubr.msk.bf16.mxu1 (!%p365_p11), %vm1242_vm0, %v1241_v8  ;;  %s373_s14 = scalar_lea.vmem (!%p365_p11), [#allocation2], %s1000_s11  ;;  %s380_s15 = scalar_lea.vmem (!%p365_p11), [#allocation3], %s1000_s11  ;;  %vm477_vm1 = vcmask (!%p365_p11), 261120   ;;  %v1182_v26 = vld [vmem:[%s1497_s4] sm:$0xff] (!%p365_p11)   ;;  %v579_v27 = vld [vmem:[%s1498_s5 + $0x8] sm:$0xff] (!%p365_p11)  ;;  %v581_v28 = vld [vmem:[%s1498_s5 + $0x18] sm:$0xff] (!%p365_p11) }
  0x2b   : > { %v417_v9 = vld [vmem:[%s373_s14] sm:$0xff] (!%p365_p11)  ;;  %v418_v10 = vld [vmem:[%s373_s14 + $0x8] sm:$0xff] (!%p365_p11)  ;;  %v419_v11 = vld [vmem:[%s373_s14 + $0x10] sm:$0xff] (!%p365_p11)  ;;  %1178 = vset.pattern.permute.xlu0 (!%p365_p11), %v1243_v15  ;;  %1179 = vset.pattern.permute.xlu1 (!%p365_p11), %v1243_v15  ;;  %s1115_s21 = smul.u32 (!%p365_p11), 36, %s1367_s12  ;;  %vm568_vm2 = vcmask (!%p365_p11), 1040384  }
  0x2c   : > { %v421_v12 = vpack.c.bf16 (!%p365_p11), %v418_v10, %v417_v9  ;;  %v420_v13 = vld [vmem:[%s373_s14 + $0x18] sm:$0xff] (!%p365_p11)  ;;  %v423_v14 = vld [vmem:[%s380_s15] sm:$0xff] (!%p365_p11)  ;;  %v424_v16 = vld [vmem:[%s380_s15 + $0x8] sm:$0xff] (!%p365_p11)  ;;  %584 = vperm.xlu0 (!%p365_p11), %1178, %v578_v21   ;;  %594 = vperm.xlu1 (!%p365_p11), %1179, %v580_v24   ;;  %vm569_vm3 = vsmask.f32 (!%p365_p11), 256  ;;  %s1114_s23 = smul.u32 (!%p365_p11), 20, %s1367_s12 }
  0x2d   : > { %v422_v17 = vpack.c.bf16 (!%p365_p11), %v420_v13, %v419_v11  ;;  %v427_v18 = vpack.c.bf16 (!%p365_p11), %v424_v16, %v423_v14  ;;  %v425_v19 = vld [vmem:[%s380_s15 + $0x10] sm:$0xff] (!%p365_p11)  ;;  %v426_v20 = vld [vmem:[%s380_s15 + $0x18] sm:$0xff] (!%p365_p11)  ;;  %v1183_v29 = vld [vmem:[%s1495_s2 + $0x8] sm:$0xff] (!%p365_p11)   ;;  %s1421_s22 = scalar_lea.vmem (!%p365_p11), [#allocation5], %s1115_s21  ;;  %v1244_v37 = vmov (!%p365_p11), 1.0|1.0  }
  0x2e   : > { %1087 = vmatpush3.bf16.msra.mxu0 (!%p365_p11), %v421_v12  ;;  %1112 = vmatpush3.bf16.msra.mxu1 (!%p365_p11), %v421_v12  ;;  %v428_v25 = vpack.c.bf16 (!%p365_p11), %v426_v20, %v425_v19  ;;  %v1184_v30 = vld [vmem:[%s1497_s4 + $0x8] sm:$0xff] (!%p365_p11)   ;;  %v438_v31 = vld [vmem:[%s1496_s3 + $0x20] sm:$0x1] (!%p365_p11)  ;;  %v436_v34 = vld [vmem:[%s1496_s3 + $0x10] sm:$0xff] (!%p365_p11)  ;;  %v1025_v38 = vcombine.low (!%p365_p11), %v1244_v37, %v1244_v37  ;;  %s1432_s20 = scalar_lea.vmem (!%p365_p11), [#allocation4], %s1114_s23 }
  0x2f   : > { %1088 = vmatprep.subr.bf16.mxu0 (!%p365_p11), %v1241_v8  ;;  %1111 = vmatprep.subr.bf16.mxu1 (!%p365_p11), %v1241_v8  ;;  %v434_v32 = vld [vmem:[%s1496_s3] sm:$0xff] (!%p365_p11)  ;;  %v435_v33 = vld [vmem:[%s1496_s3 + $0x8] sm:$0xff] (!%p365_p11)  ;;  %v437_v35 = vld [vmem:[%s1496_s3 + $0x18] sm:$0xff] (!%p365_p11) }
  0x30   : > { %589 = vperm.xlu0 %1178, %v579_v27   ;;  %599 = vperm.xlu1 %1179, %v581_v28   ;;  %v716_v36 = vld [vmem:[%s1421_s22 + $0x20] sm:$0x1]  ;;  %vm1424_vm4 = vmand %vm568_vm2, %vm569_vm3  ;;  %v571_v54 = vld [vmem:[%s1432_s20 + $0x10] sm:$0x1]  ;;  %s1116_s12 = smul.u32 (%p1337_p6), 10, %s1227_s27 }
  0x31   : > { %v717_v40 = vsel %vm1424_vm4, %v1025_v38, %v716_v36 }
  0x32   : > { %1089 = vmatpush3.bf16.msra.mxu0 %v422_v17  ;;  %1113 = vmatpush3.bf16.msra.mxu1 %v422_v17  ;;  %718 = vst [vmem:[%s1421_s22 + $0x20] sm:$0x1] %v717_v40  ;;  %s731_s10 = sadd.s32 (%p1337_p6), %s1223_s26, %s1116_s12 }
  0x33   : > { %1102 = vmatprep.subr.bf16.mxu1 %v427_v18  ;;  %s1026_s11 = sshll.u32 (%p1337_p6), %s731_s10, 2 }
  0x34   : > { %461 = vperm.xlu0 %1178, %v438_v31   ;;  %441 = vperm.xlu1 %1179, %v434_v32   ;;  %s733_s24 = scalar_lea.vmem (%p1337_p6), %s1499_s6, %s1026_s11 }
  0x35   : > { %1091 = vmatmul.mubr.msk.bf16.vlgmr.msra.gmra.mrb[0].mxu0 %vm477_vm1, %v1180_v22  ;;  %1099 = vmatmul.mubr.msk.bf16.vlgmr.msra.gmra.mrb[0].mxu1 %vm477_vm1, %v1181_v23 }
  0x36   : > { %1103 = vmatpush3.bf16.msra.mxu1 %v427_v18  ;;  %1094 = vmatprep.mubr.msk.bf16.mxu0 %vm1242_vm0, %v1241_v8 }
  0x37   : > { %1104 = vmatprep.subr.bf16.mxu1 %v428_v25  ;;  %1106 = vmatprep.mubr.msk.bf16.mxu1 %vm477_vm1, %v1182_v26 }
  0x38   : > { %446 = vperm.xlu0 %1178, %v435_v33   ;;  %451 = vperm.xlu1 %1179, %v436_v34  }
  0x3a   : > { %1105 = vmatpush3.bf16.msra.mxu1 %v428_v25 }
  0x3c   : > { %456 = vperm.xlu0 %1178, %v437_v35  }
  0x3d   : > { %1095 = vmatmul.mubr.msk.bf16.gmra.mrb[4].mxu0 %vm477_vm1, %v1183_v29  ;;  %1107 = vmatmul.mubr.msk.bf16.vlgmr.msra.gmra.mrb[4].mxu1 %vm477_vm1, %v1184_v30 }
  0xab   : > { %v585_v41 = vpop.permute.xlu0 %584  ;;  %v595_v43 = vpop.permute.xlu1 %594 }
  0xaf   : > { %v590_v42 = vpop.permute.xlu0 %589  ;;  %v600_v45 = vpop.permute.xlu1 %599 }
  0xb3   : > { %v462_v44 = vpop.permute.xlu0 %461  ;;  %v442_v47 = vpop.permute.xlu1 %441 }
  0xb7   : > { %v447_v46 = vpop.permute.xlu0 %446  ;;  %v452_v0 = vpop.permute.xlu1 %451 }
  0xbb   : > { %v457_v63 = vpop.permute.xlu0 %456 }
 0x108   : > { %v521_v48 = vpop.f32.mrb[0].mxu0  ;;  %v537_v49 = vpop.f32.mrb[0].mxu1 }
 0x109   : > { %v522_v50 = vadd.f32 %v521_v48, %v442_v47  ;;  %v538_v51 = vadd.f32 %v537_v49, %v462_v44  ;;  %v1092_v52 = vpop.f32.mrb[1].mxu0  ;;  %v1100_v53 = vpop.f32.mrb[1].mxu1 }
 0x10a   : > { %v524_v55 = vpop.f32.mrb[2].mxu0  ;;  %v540_v56 = vpop.f32.mrb[2].mxu1 }
 0x10b   : > { %v1034_v57 = vpack.c.bf16 %v538_v51, %v538_v51  ;;  %v525_v58 = vadd.f32 %v524_v55, %v447_v46  ;;  %v1101_v59 = vpop.f32.mrb[3].mxu1  ;;  %v1093_v60 = vpop.f32.mrb[3].mxu0 }
 0x10d   : > { %v572_v61 = vsel %vm1424_vm4, %v1034_v57, %v571_v54  ;;  %v1046_v62 = vpack.c.bf16 %v525_v58, %v522_v50 }
 0x10e   : > { %573 = vst [vmem:[%s1432_s20 + $0x10] sm:$0x1] %v572_v61 }
 0x10f   : > { %1047 = vst [vmem:[%s1432_s20] sm:$0xff] %v1046_v62  }
 0x110   : > { %v529_v1 = vpop.f32.mrb[4].mxu0  ;;  %v1108_v2 = vpop.f32.mrb[4].mxu1 }
 0x111   : > { %v661_v3 = vadd.f32 %v1108_v2, %v595_v43  ;;  %v1096_v4 = vpop.f32.mrb[5].mxu0  ;;  %v652_v5 = vpop.f32.mrb[5].mxu1  ;;  %v530_v9 = vadd.f32 %v529_v1, %v452_v0 }
 0x112   : > { %v653_v6 = vadd.f32 %v652_v5, %v585_v41  ;;  %v532_v7 = vpop.f32.mrb[6].mxu0  ;;  %v1109_v8 = vpop.f32.mrb[6].mxu1 }
 0x113   : > { %v533_v10 = vadd.f32 %v532_v7, %v457_v63  ;;  %v664_v11 = vadd.f32 %v1109_v8, %v600_v45  ;;  %v655_v12 = vpop.f32.mrb[7].mxu1  ;;  %v1097_v13 = vpop.f32.mrb[7].mxu0  ;;  %v669_v15 = vmul.f32 %v661_v3, %v661_v3 }
 0x114   : > { %v656_v14 = vadd.f32 %v655_v12, %v590_v42  ;;  %v667_v19 = vmul.f32 %v653_v6, %v653_v6  ;;  %729 = sbr.rel (!%p1337_p6) target bundleno = 288 (0x120), region = 124 }
 0x115   : > { %v1051_v16 = vpack.c.bf16 %v533_v10, %v530_v9  ;;  %v670_v17 = vmul.f32 %v664_v11, %v664_v11  ;;  %v1061_v18 = vpack.c.bf16 %v664_v11, %v661_v3  ;;  %v757_v28 = vld [vmem:[%s1432_s20 + $0x10] sm:$0xf] (%p1337_p6) }
 0x116   : > { %v668_v20 = vmul.f32 %v656_v14, %v656_v14  ;;  %v1056_v21 = vpack.c.bf16 %v656_v14, %v653_v6  ;;  %v749_v24 = vld [vmem:[%s1432_s20] sm:$0xf] (%p1337_p6)  ;;  %v751_v25 = vld [vmem:[%s1432_s20 + $0x4] sm:$0xf] (%p1337_p6)  ;;  %758 = vst [vmem:[%s733_s24 + $0x20] sm:$0xf] (%p1337_p6), %v757_v28 }
 0x117   : > { %1073 = vst [vmem:[%s1432_s20 + $0x8] sm:$0xff] %v1051_v16   ;;  %1074 = vst [vmem:[%s1421_s22 + $0x8] sm:$0xff] %v1061_v18   ;;  %v1071_v22 = vpack.c.bf16 %v670_v17, %v669_v15 }
 0x118   : > { %1057 = vst [vmem:[%s1421_s22] sm:$0xff] %v1056_v21   ;;  %v1066_v23 = vpack.c.bf16 %v668_v20, %v667_v19  ;;  %750 = vst [vmem:[%s733_s24] sm:$0xf] (%p1337_p6), %v749_v24 }
 0x119   : > { %1076 = vst [vmem:[%s1421_s22 + $0x18] sm:$0xff] %v1071_v22   ;;  %752 = vst [vmem:[%s733_s24 + $0x8] sm:$0xf] (%p1337_p6), %v751_v25 }
 0x11a   : > { %1075 = vst [vmem:[%s1421_s22 + $0x10] sm:$0xff] %v1066_v23  }
 0x11e   : > { %v753_v26 = vld [vmem:[%s1432_s20 + $0x8] sm:$0xf]  ;;  %v755_v27 = vld [vmem:[%s1432_s20 + $0xc] sm:$0xf] }
 0x11f   : > { %754 = vst [vmem:[%s733_s24 + $0x10] sm:$0xf] %v753_v26  ;;  %756 = vst [vmem:[%s733_s24 + $0x18] sm:$0xf] %v755_v27 }
 0x120 PF: > { %791 = sbr.rel (!%p1337_p6) target bundleno = 299 (0x12b), region = 165  ;;  %v827_v37 = vld [vmem:[%s1421_s22 + $0x20] sm:$0xf] (%p1337_p6) }
 0x121   : > { %s1117_s16 = smul.u32 (%p1337_p6), 18, %s1227_s27 }
 0x123   : > { %v815_v31 = vld [vmem:[%s1421_s22 + $0x8] sm:$0xf] (%p1337_p6)  ;;  %v817_v32 = vld [vmem:[%s1421_s22 + $0xc] sm:$0xf] (%p1337_p6)  ;;  %s793_s18 = sadd.s32 (%p1337_p6), %s1223_s26, %s1117_s16 }
 0x124   : > { %v811_v29 = vld [vmem:[%s1421_s22] sm:$0xf] (%p1337_p6)  ;;  %v813_v30 = vld [vmem:[%s1421_s22 + $0x4] sm:$0xf] (%p1337_p6)  ;;  %s1027_s13 = sshll.u32 (%p1337_p6), %s793_s18, 2 }
 0x125   : > { %v823_v35 = vld [vmem:[%s1421_s22 + $0x18] sm:$0xf] (%p1337_p6)  ;;  %v825_v36 = vld [vmem:[%s1421_s22 + $0x1c] sm:$0xf] (%p1337_p6)  ;;  %s795_s23 = scalar_lea.vmem (%p1337_p6), %s1500_s7, %s1027_s13 }
 0x126   : > { %v819_v33 = vld [vmem:[%s1421_s22 + $0x10] sm:$0xf] (%p1337_p6)  ;;  %v821_v34 = vld [vmem:[%s1421_s22 + $0x14] sm:$0xf] (%p1337_p6)  ;;  %812 = vst [vmem:[%s795_s23] sm:$0xf] (%p1337_p6), %v811_v29 }
 0x127   : > { %814 = vst [vmem:[%s795_s23 + $0x8] sm:$0xf] %v813_v30  ;;  %816 = vst [vmem:[%s795_s23 + $0x10] sm:$0xf] %v815_v31 }
 0x128   : > { %818 = vst [vmem:[%s795_s23 + $0x18] sm:$0xf] %v817_v32  ;;  %820 = vst [vmem:[%s795_s23 + $0x20] sm:$0xf] %v819_v33 }
 0x129   : > { %822 = vst [vmem:[%s795_s23 + $0x28] sm:$0xf] %v821_v34  ;;  %824 = vst [vmem:[%s795_s23 + $0x30] sm:$0xf] %v823_v35 }
 0x12a   : > { %826 = vst [vmem:[%s795_s23 + $0x38] sm:$0xf] %v825_v36  ;;  %828 = vst [vmem:[%s795_s23 + $0x40] sm:$0xf] %v827_v37 }
 0x12b PF: > { %s18_s30 = sadd.s32 1, %s1239_s30   ;;  %s1505_s24 = smov %s1219_s25 }
 0x12c   : > { %p15_p12 = scmp.ge.s32.totalorder %s18_s30, 6   ;;  %s1506_s25 = smov %s1345_s17 }
 0x12d   : > { %s1507_s26 = smov %s1231_s28  ;;  %s1508_s27 = smov %s1235_s29 }
 0x12e   : > { %s1509_s28 = smov %s1512_s8  ;;  %s1510_s29 = smov %s1516_s9 }
 0x12f   :  { %17 = sbr.rel (!%p15_p12) target bundleno = 4 (0x4), region = 257 }

// kernel: attn_adain.3
= control target key start
LH: loop header
LB: loop body
LE: loop exit
PB: predicated region body
PF: predicated region fallthrough
CT: control target
= control target key end

     0   :  { %s2091_s0 = inlined_call_operand.vmem [shape: f32[2,32,256], index: 0, kind: input, shape index: {}]   ;;  %s2092_s1 = inlined_call_operand.vmem [shape: bf16[2,33,256], index: 1, kind: input, shape index: {}]   ;;  %s2093_s2 = inlined_call_operand.vmem [shape: bf16[2,65,256], index: 2, kind: input, shape index: {}]   ;;  %s2094_s3 = inlined_call_operand.vmem [shape: f32[2,32,256], index: 3, kind: input, shape index: {}]   ;;  %s2095_s4 = inlined_call_operand.vmem [shape: f32[2,32,1], index: 4, kind: input, shape index: {}]   ;;  %s2096_s5 = inlined_call_operand.vmem [shape: f32[2,32,1], index: 5, kind: input, shape index: {}]   ;;  %s2097_s6 = inlined_call_operand.vmem [shape: f32[2,32,256], index: 6, kind: output, shape index: {}]  }
   0x1   :  { %2101 = sst [smem:[#allocation13_spill]] %s2091_s0 }
   0x2   :  { %2102 = sst [smem:[#allocation14_spill]] %s2092_s1 }
   0x3   :  { %2103 = sst [smem:[#allocation15_spill]] %s2093_s2 }
   0x4   :  { %2104 = sst [smem:[#allocation16_spill]] %s2097_s6 }
   0x5   :  { %s1790_s21 = smov 0   ;;  %s1792_s22 = smov 0  }
   0x6   :  { %s1794_s23 = smov 0   ;;  %s1796_s24 = smov 0  }
   0x7   :  { %s1798_s25 = smov 0   ;;  %s1800_s26 = smov 0  }
   0x8   :  { %s1802_s27 = smov 0   ;;  %s1804_s28 = smov 0  }
   0x9   :  { %s1806_s29 = smov 0   ;;  %s1808_s30 = smov 0  }
   0xa   :  { %s1810_s7 = smov 0  }
   0xb LB: > { %2105 = sst [smem:[#allocation9_spill]] %s1727_s26  ;;  %s28_s8 = sadd.s32 1, %s1735_s28  ;;  %s1747_s7 = sphi %s1810_s7, %s16_s7   ;;  %s1743_s30 = sphi %s1808_s30, %s2129_s30   ;;  %s1739_s29 = sphi %s1806_s29, %s2128_s29   ;;  %s1735_s28 = sphi %s1804_s28, %s2127_s28   ;;  %s1731_s27 = sphi %s1802_s27, %s2126_s27   ;;  %s1727_s26 = sphi %s1800_s26, %s2125_s26   ;;  %s1723_s25 = sphi %s1798_s25, %s2124_s25   ;;  %s1719_s24 = sphi %s1796_s24, %s2123_s24   ;;  %s1715_s23 = sphi %s1794_s23, %s2122_s23   ;;  %s1711_s22 = sphi %s1792_s22, %s2121_s22   ;;  %s1707_s21 = sphi %s1790_s21, %s2120_s21  }
   0xc   : > { %p29_p0 = scmp.ge.s32.totalorder %s28_s8, 2  ;;  %s31_s9 = sadd.s32 1, %s1739_s29 }
   0xd   : > { %p51_p1 = scmp.ne.s32.totalorder %s1719_s24, %s1715_s23  ;;  %p52_p2 = scmp.eq.s32.totalorder %s1747_s7, 0 }
   0xe   : > { %s2131_s8 = smov (%p29_p0, %s28_s8), 0  ;;  %s2133_s9 = smov (!%p29_p0, %s31_s9), %s1739_s29 }
   0xf   : > { %2106 = sst [smem:[#allocation10_spill]] %s2131_s8  ;;  %p33_p3 = scmp.ge.s32.totalorder %s2133_s9, 2 }
  0x10   : > { %s35_s10 = sadd.s32 1, %s1743_s30  ;;  %s1380_s11 = sadd.s32 4294967295, %s1747_s7  }
  0x11   : > { %p1858_p4 = por %p52_p2, %p51_p1  ;;  %s2135_s9 = smov (%p33_p3, %s2133_s9), 0 }
  0x12   : > { %2108 = sst [smem:[#allocation11_spill]] %s2135_s9  ;;  %s2137_s10 = smov (!%p33_p3, %s35_s10), %s1743_s30 }
  0x13   : > { %s68_s13 = ssub.s32 %s1735_s28, %s2131_s8  ;;  %p79_p5 = scmp.ne.s32.totalorder %s1711_s22, %s1707_s21 }
  0x14   : > { %p37_p6 = scmp.ge.s32.totalorder %s2137_s10, 2  ;;  %p219_p7 = scmp.eq.s32.totalorder %s1380_s11, 7 }
  0x15   : > { %s40_s14 = ssub.s32 %s1739_s29, %s2135_s9  ;;  %p1871_p8 = por %p79_p5, %p52_p2 }
  0x16   : > { %s2139_s10 = smov (%p37_p6, %s2137_s10), 0  ;;  %s44_s16 = sadd.s32 1, %s1719_s24 }
  0x17   : > { %2110 = sst [smem:[#allocation12_spill]] %s2139_s10  ;;  %p1881_p9 = por %p219_p7, %p51_p1 }
  0x18   : > { %s39_s18 = ssub.s32 %s1743_s30, %s2139_s10  ;;  %s72_s19 = sadd.s32 1, %s1711_s22 }
  0x19   : > { %s41_s20 = sor.u32 %s40_s14, %s39_s18  ;;  %s69_s8 = sor.u32 %s68_s13, %s39_s18 }
  0x1a   : > { %p42_p10 = scmp.eq.s32.totalorder %s41_s20, 0  ;;  %p70_p11 = scmp.eq.s32.totalorder %s69_s8, 0 }
  0x1b   : > { %p1383_p12 = scmp.ge.s32.totalorder %s1747_s7, 8 }
  0x1c   : > { %s1889_s11 = scalar_select %p42_p10, %s1719_s24, %s44_s16  }
  0x1d   : > { %s1892_s9 = scalar_select %p70_p11, %s1711_s22, %s72_s19  }
  0x1e   : > { %241 = sbr.rel (%p1383_p12) target bundleno = 84 (0x54), region = 16 }
  0x25   : > { %244 = sbr.rel (!%p1858_p4) target bundleno = 49 (0x31), region = 20  ;;  %s246_s6 = sand.u32 (%p1858_p4), 1, %s1719_s24  }
  0x26   : > { %s1385_s10 = sshll.u32 (%p1858_p4), %s1743_s30, 3  ;;  %s1384_s26 = sshll.u32 (%p1858_p4), %s246_s6, 5 }
  0x27   : > { %s250_s14 = sadd.s32 (%p1858_p4), %s1739_s29, %s1385_s10  ;;  %s2112_s0 = sld [smem:[#allocation13_spill]] (%p1858_p4) }
  0x28   : > { %s1386_s13 = sshll.u32 (%p1858_p4), %s250_s14, 3  ;;  %s248_s19 = scalar_lea.vmem (%p1858_p4), [#allocation4], %s1384_s26 }
  0x2d   : > { %s252_s16 = scalar_lea.vmem %s2112_s0, %s1386_s13 }
  0x2e   : > { %v286_v0 = vld [vmem:[%s252_s16] sm:$0xff]  ;;  %v288_v1 = vld [vmem:[%s252_s16 + $0x10] sm:$0xff] }
  0x2f   : > { %v290_v2 = vld [vmem:[%s252_s16 + $0x20] sm:$0xff]  ;;  %287 = vst [vmem:[%s248_s19] sm:$0xff] %v286_v0  ;;  %289 = vst [vmem:[%s248_s19 + $0x8] sm:$0xff] %v288_v1  ;;  %v292_v3 = vld [vmem:[%s252_s16 + $0x30] sm:$0xff] }
  0x30   : > { %291 = vst [vmem:[%s248_s19 + $0x10] sm:$0xff] %v290_v2  ;;  %293 = vst [vmem:[%s248_s19 + $0x18] sm:$0xff] %v292_v3 }
  0x31 PF: > { %299 = sbr.rel (!%p1871_p8) target bundleno = 61 (0x3d), region = 58  ;;  %s301_s6 = sand.u32 (%p1871_p8), 1, %s1711_s22  }
  0x32   : > { %s1524_s10 = smul.u32 (%p1871_p8), 10, %s1743_s30  ;;  %s2113_s1 = sld [smem:[#allocation14_spill]] (%p1871_p8) }
  0x33   : > { %s1523_s20 = smul.u32 (%p1871_p8), 20, %s301_s6 }
  0x34   : > { %s305_s14 = sadd.s32 (%p1871_p8), %s1735_s28, %s1524_s10 }
  0x35   : > { %s1387_s13 = sshll.u32 (%p1871_p8), %s305_s14, 2  ;;  %s303_s16 = scalar_lea.vmem (%p1871_p8), [#allocation5], %s1523_s20 }
  0x38   : > { %s307_s26 = scalar_lea.vmem %s2113_s1, %s1387_s13 }
  0x39   : > { %v323_v4 = vld [vmem:[%s307_s26] sm:$0xf]  ;;  %v325_v5 = vld [vmem:[%s307_s26 + $0x8] sm:$0xf]  ;;  %v327_v6 = vld [vmem:[%s307_s26 + $0x10] sm:$0xf] }
  0x3a   : > { %324 = vst [vmem:[%s303_s16] sm:$0xf] %v323_v4  ;;  %326 = vst [vmem:[%s303_s16 + $0x4] sm:$0xf] %v325_v5  ;;  %v329_v7 = vld [vmem:[%s307_s26 + $0x18] sm:$0xf] }
  0x3b   : > { %328 = vst [vmem:[%s303_s16 + $0x8] sm:$0xf] %v327_v6  ;;  %v331_v8 = vld [vmem:[%s307_s26 + $0x20] sm:$0xf]  ;;  %330 = vst [vmem:[%s303_s16 + $0xc] sm:$0xf] %v329_v7 }
  0x3c   : > { %332 = vst [vmem:[%s303_s16 + $0x10] sm:$0xf] %v331_v8 }
  0x3d PF: > { %365 = sbr.rel (!%p1871_p8) target bundleno = 76 (0x4c), region = 99  ;;  %s367_s19 = sand.u32 (%p1871_p8), 1, %s1711_s22  }
  0x3e   : > { %s1526_s6 = smul.u32 (%p1871_p8), 18, %s1743_s30  ;;  %s2114_s2 = sld [smem:[#allocation15_spill]] (%p1871_p8) }
  0x3f   : > { %s1525_s10 = smul.u32 (%p1871_p8), 36, %s367_s19 }
  0x40   : > { %s371_s14 = sadd.s32 (%p1871_p8), %s1735_s28, %s1526_s6 }
  0x41   : > { %s1388_s13 = sshll.u32 (%p1871_p8), %s371_s14, 2  ;;  %s369_s26 = scalar_lea.vmem (%p1871_p8), [#allocation6], %s1525_s10 }
  0x44   : > { %s373_s8 = scalar_lea.vmem %s2114_s2, %s1388_s13 }
  0x45   : > { %v389_v9 = vld [vmem:[%s373_s8] sm:$0xf]  ;;  %v391_v10 = vld [vmem:[%s373_s8 + $0x8] sm:$0xf]  ;;  %v393_v11 = vld [vmem:[%s373_s8 + $0x10] sm:$0xf] }
  0x46   : > { %390 = vst [vmem:[%s369_s26] sm:$0xf] %v389_v9  ;;  %392 = vst [vmem:[%s369_s26 + $0x4] sm:$0xf] %v391_v10  ;;  %v395_v12 = vld [vmem:[%s373_s8 + $0x18] sm:$0xf] }
  0x47   : > { %394 = vst [vmem:[%s369_s26 + $0x8] sm:$0xf] %v393_v11  ;;  %v397_v13 = vld [vmem:[%s373_s8 + $0x20] sm:$0xf]  ;;  %v399_v14 = vld [vmem:[%s373_s8 + $0x28] sm:$0xf] }
  0x48   : > { %396 = vst [vmem:[%s369_s26 + $0xc] sm:$0xf] %v395_v12  ;;  %398 = vst [vmem:[%s369_s26 + $0x10] sm:$0xf] %v397_v13  ;;  %v401_v15 = vld [vmem:[%s373_s8 + $0x30] sm:$0xf] }
  0x49   : > { %400 = vst [vmem:[%s369_s26 + $0x14] sm:$0xf] %v399_v14  ;;  %v403_v16 = vld [vmem:[%s373_s8 + $0x38] sm:$0xf]  ;;  %v405_v17 = vld [vmem:[%s373_s8 + $0x40] sm:$0xf] }
  0x4a   : > { %402 = vst [vmem:[%s369_s26 + $0x18] sm:$0xf] %v401_v15  ;;  %404 = vst [vmem:[%s369_s26 + $0x1c] sm:$0xf] %v403_v16 }
  0x4b   : > { %406 = vst [vmem:[%s369_s26 + $0x20] sm:$0xf] %v405_v17 }
  0x4c PF: > { %447 = sbr.rel (!%p1858_p4) target bundleno = 84 (0x54), region = 140  ;;  %s449_s15 = sand.u32 (%p1858_p4), 1, %s1719_s24  }
  0x4d   : > { %s1390_s16 = sshll.u32 (%p1858_p4), %s1743_s30, 3  ;;  %s1389_s19 = sshll.u32 (%p1858_p4), %s449_s15, 5 }
  0x4e   : > { %s453_s6 = sadd.s32 (%p1858_p4), %s1739_s29, %s1390_s16  ;;  %s451_s18 = scalar_lea.vmem (%p1858_p4), [#allocation7], %s1389_s19 }
  0x4f   : > { %s1391_s10 = sshll.u32 (%p1858_p4), %s453_s6, 3 }
  0x50   : > { %s455_s20 = scalar_lea.vmem (%p1858_p4), %s2094_s3, %s1391_s10 }
  0x51   : > { %v489_v18 = vld [vmem:[%s455_s20] sm:$0xff] (%p1858_p4)  ;;  %v491_v19 = vld [vmem:[%s455_s20 + $0x10] sm:$0xff] (%p1858_p4) }
  0x52   : > { %v493_v20 = vld [vmem:[%s455_s20 + $0x20] sm:$0xff] (%p1858_p4)  ;;  %490 = vst [vmem:[%s451_s18] sm:$0xff] (%p1858_p4), %v489_v18  ;;  %492 = vst [vmem:[%s451_s18 + $0x8] sm:$0xff] (%p1858_p4), %v491_v19  ;;  %v495_v21 = vld [vmem:[%s455_s20 + $0x30] sm:$0xff] (%p1858_p4) }
  0x53   : > { %494 = vst [vmem:[%s451_s18 + $0x10] sm:$0xff] %v493_v20  ;;  %496 = vst [vmem:[%s451_s18 + $0x18] sm:$0xff] %v495_v21 }
  0x54 PF: > { %p1392_p13 = scmp.ge.s32.totalorder %s1747_s7, 1  ;;  %p517_p0 = scmp.lt.s32.totalorder %s1747_s7, 9 }
  0x56   : > { %p518_p1 = pnand %p1392_p13, %p517_p0 }
  0x57   : > { %s524_s12 = sand.u32 (!%p518_p1), 1, %s1715_s23   ;;  %s531_s8 = sand.u32 (!%p518_p1), 1, %s1707_s21  }
  0x58   : > { %521 = sbr.rel (%p518_p1) target bundleno = 823 (0x337), region = 186  ;;  %s1393_s26 = sshll.u32 (!%p518_p1), %s524_s12, 5 }
  0x59   : > { %s1527_s15 = smul.u32 (!%p518_p1), 20, %s531_s8  ;;  %p595_p2 = scmp.lt.s32.totalorder (!%p518_p1), %s1731_s27, 1 }
  0x5a   : > { %s1528_s16 = smul.u32 (!%p518_p1), 36, %s531_s8  ;;  %s526_s1 = scalar_lea.vmem (!%p518_p1), [#allocation4], %s1393_s26 }
  0x5b   : > { %s533_s2 = scalar_lea.vmem (!%p518_p1), [#allocation5], %s1527_s15  ;;  %s1945_s21 = scalar_lea.vmem (!%p518_p1), [#allocation7], %s1393_s26 }
  0x5c   : > { %s1943_s23 = scalar_lea.vmem (!%p518_p1), [#allocation6], %s1528_s16  ;;  %s1947_s12 = scalar_lea.vmem (!%p518_p1), [#allocation8], %s1393_s26 }
  0x5d   : > { %p1400_p3 = scmp.ne.s32.totalorder (!%p518_p1), %s1723_s25, 0 }
  0x5f   : > { %s596_s19 = scalar_select %p595_p2, %s1731_s27, 1 }
  0x60   : > { %610 = sbr.rel (%p1400_p3) target bundleno = 103 (0x67), region = 206  ;;  %v1749_v22 = vmov (!%p1400_p3), -inf   ;;  %v1750_v23 = vmov (!%p1400_p3), 0.0  }
  0x61   : > { %s1423_s6 = sshll.u32 %s596_s19, 5  ;;  %611 = vst [vmem:[#allocation2] sm:$0x1] (!%p1400_p3), %v1749_v22  ;;  %612 = vst [vmem:[#allocation3] sm:$0xff] (!%p1400_p3), %v1750_v23 }
  0x62   : > { %s1936_s13 = scalar_lea.vmem %s2095_s4, %s1423_s6  ;;  %s1941_s0 = scalar_lea.vmem %s2096_s5, %s1423_s6  ;;  %613 = vst [vmem:[#allocation3 + $0x8] sm:$0xff] (!%p1400_p3), %v1750_v23  ;;  %614 = vst [vmem:[#allocation3 + $0x10] sm:$0xff] (!%p1400_p3), %v1750_v23 }
  0x63   : > { %615 = vst [vmem:[#allocation3 + $0x18] sm:$0xff] (!%p1400_p3), %v1750_v23  ;;  %616 = vst [vmem:[#allocation3 + $0x20] sm:$0xff] (!%p1400_p3), %v1750_v23 }
  0x64   : > { %617 = vst [vmem:[#allocation3 + $0x28] sm:$0xff] (!%p1400_p3), %v1750_v23  ;;  %618 = vst [vmem:[#allocation3 + $0x30] sm:$0xff] (!%p1400_p3), %v1750_v23 }
  0x65   : > { %619 = vst [vmem:[#allocation3 + $0x38] sm:$0xff] (!%p1400_p3), %v1750_v23  ;;  %620 = vst [vmem:[#allocation3 + $0x40] sm:$0x1] (!%p1400_p3), %v1750_v23 }
  0x67 PF: > { %v1623_v24 = vld [vmem:[%s533_s2] sm:$0xff]   ;;  %vm689_vm0 = vcmask 1040384   ;;  %v1624_v25 = vld [vmem:[%s533_s2 + $0x8] sm:$0xff]   ;;  %v1625_v30 = vld [vmem:[%s533_s2 + $0x10] ss:$0 sps:$4 sm:$0x11]   ;;  %v819_v14 = vlaneseq }
  0x68   : > { %648 = vxpose.xlu0.c.b16.start [1/3] (short) %v1623_v24, 128  ;;  %v621_v26 = vld [vmem:[%s526_s1] sm:$0xff]  ;;  %v622_v27 = vld [vmem:[%s526_s1 + $0x8] sm:$0xff]  ;;  %v623_v28 = vld [vmem:[%s526_s1 + $0x10] sm:$0xff]  ;;  %v1751_v33 = vmov 0   ;;  %vm664_vm1 = vcmask 269312   ;;  %v1752_v44 = vmov 0.0  }
  0x69   : > { %v624_v29 = vld [vmem:[%s526_s1 + $0x18] sm:$0xff]  ;;  %v625_v31 = vpack.c.bf16 %v622_v27, %v621_v26  ;;  %v691_v34 = vsel %vm689_vm0, 65535, %v1751_v33  ;;  %1507 = vmatprep.subr.bf16.mxu1 %v1752_v44  ;;  %vm1753_vm2 = vmmov 0   ;;  %v820_v17 = vshrl.u32 %v819_v14, 7  ;;  %v792_v19 = vld [vmem:[#allocation2] sm:$0x1] }
  0x6a   : > { %v626_v32 = vpack.c.bf16 %v624_v29, %v623_v28  ;;  %v693_v35 = vand.u32 1065369472, %v691_v34  ;;  %1491 = vmatprep.mubr.msk.bf16.mxu1 %vm1753_vm2, %v1752_v44  ;;  %p1417_p4 = scmp.ne.s32.totalorder %s1723_s25, 1 }
  0x6b   : > { %1449 = vmatprep.subr.bf16.mxu0 %v625_v31  ;;  %v1964_v21 = vsub.s32 0, %v820_v17 }
  0x6c   : > { %649 = vxpose.xlu0.c.b16.cont [2/3] (short) %v1624_v25, 128  ;;  %1450 = vmatpush3.bf16.msra.mxu0 %v625_v31 }
  0x6d   : > { %1451 = vmatprep.subr.bf16.mxu0 %v626_v32 }
  0x70   : > { %650 = vxpose.xlu0.c.b16.end [3/3] (short) %v1625_v30, 128  ;;  %1452 = vmatpush3.bf16.msra.mxu0 %v626_v32 }
  0x71   : > { %1453 = vmatprep.subr.bf16.mxu0 %v693_v35 }
  0x74   : > { %1454 = vmatpush3.bf16.msra.mxu0 %v693_v35 }
  0x75   : > { %1471 = vmatprep.subr.bf16.mxu0 %v1752_v44 }
  0xce   : > { %v656_v36 = vpop.trf.xlu0 }
  0xcf   : > { %1455 = vmatprep.mubr.msk.bf16.mxu0 %vm664_vm1, %v656_v36 }
  0xd2   : > { %v657_v37 = vpop.trf.xlu0 }
  0xd3   : > { %1456 = vmatmul.mubr.msk.bf16.vlgmr.msra.gmra.mrb[0].mxu0 %vm664_vm1, %v657_v37 }
  0xd6   : > { %v658_v38 = vpop.trf.xlu0 }
  0xd7   : > { %1459 = vmatprep.mubr.msk.bf16.mxu0 %vm664_vm1, %v658_v38 }
  0xda   : > { %v659_v39 = vpop.trf.xlu0 }
  0xdb   : > { %1460 = vmatmul.mubr.msk.bf16.gmra.mrb[4].mxu0 %vm664_vm1, %v659_v39 }
  0xde   : > { %v660_v40 = vpop.trf.xlu0 }
  0xdf   : > { %1463 = vmatprep.mubr.msk.bf16.mxu0 %vm664_vm1, %v660_v40 }
  0xe2   : > { %v661_v41 = vpop.trf.xlu0 }
  0xe3   : > { %1464 = vmatmul.mubr.msk.bf16.gmra.mrb[8].mxu0 %vm664_vm1, %v661_v41 }
  0xe6   : > { %v662_v42 = vpop.trf.xlu0 }
  0xe7   : > { %1467 = vmatprep.mubr.msk.bf16.mxu0 %vm664_vm1, %v662_v42 }
  0xea   : > { %v663_v43 = vpop.trf.xlu0 }
  0xeb   : > { %1468 = vmatmul.mubr.msk.bf16.gmra.mrb[12].mxu0 %vm664_vm1, %v663_v43 }
  0xec   : > { %1487 = vmatprep.mubr.msk.bf16.mxu0 %vm1753_vm2, %v1752_v44 }
 0x1a6   : > { %v1457_v45 = vpop.f32.mrb[0].mxu0 }
 0x1a7   : > { %v729_v46 = vpop.f32.mrb[1].mxu0 }
 0x1a8   : > { %v1458_v47 = vpop.f32.mrb[2].mxu0 }
 0x1a9   : > { %v732_v48 = vpop.f32.mrb[3].mxu0 }
 0x1ae   : > { %v1461_v49 = vpop.f32.mrb[4].mxu0 }
 0x1af   : > { %v795_v50 = vmax.f32 %v1457_v45, %v1461_v49  ;;  %v745_v51 = vpop.f32.mrb[5].mxu0 }
 0x1b0   : > { %v793_v52 = vmax.f32 %v729_v46, %v745_v51  ;;  %v1462_v53 = vpop.f32.mrb[6].mxu0 }
 0x1b1   : > { %v796_v54 = vmax.f32 %v1458_v47, %v1462_v53  ;;  %v748_v55 = vpop.f32.mrb[7].mxu0 }
 0x1b2   : > { %v794_v56 = vmax.f32 %v732_v48, %v748_v55 }
 0x1b6   : > { %v1465_v57 = vpop.f32.mrb[8].mxu0 }
 0x1b7   : > { %v799_v58 = vmax.f32 %v795_v50, %v1465_v57  ;;  %v761_v59 = vpop.f32.mrb[9].mxu0 }
 0x1b8   : > { %v797_v60 = vmax.f32 %v793_v52, %v761_v59  ;;  %v1466_v61 = vpop.f32.mrb[10].mxu0 }
 0x1b9   : > { %v800_v62 = vmax.f32 %v796_v54, %v1466_v61  ;;  %v764_v63 = vpop.f32.mrb[11].mxu0 }
 0x1ba   : > { %v798_v0 = vmax.f32 %v794_v56, %v764_v63 }
 0x1be   : > { %v1469_v1 = vpop.f32.mrb[12].mxu0 }
 0x1bf   : > { %v803_v2 = vmax.f32 %v799_v58, %v1469_v1  ;;  %v777_v3 = vpop.f32.mrb[13].mxu0 }
 0x1c0   : > { %v801_v4 = vmax.f32 %v797_v60, %v777_v3  ;;  %v1470_v5 = vpop.f32.mrb[14].mxu0 }
 0x1c1   : > { %v804_v6 = vmax.f32 %v800_v62, %v1470_v5  ;;  %v780_v7 = vpop.f32.mrb[15].mxu0 }
 0x1c2   : > { %v802_v8 = vmax.f32 %v798_v0, %v780_v7 }
 0x1c3   : > { %v806_v9 = vmax.f32 %v803_v2, %v804_v6  ;;  %v1627_v6 = vld [vmem:[%s1943_s23 + $0x8] sm:$0xff]  }
 0x1c4   : > { %v805_v10 = vmax.f32 %v801_v4, %v802_v8  ;;  %v1629_v8 = vld [vmem:[%s1943_s23 + $0x18] sm:$0xff]  }
 0x1c6   : > { %v807_v11 = vmax.f32 %v805_v10, %v806_v9  ;;  %v1630_v9 = vld [vmem:[%s1943_s23 + $0x20] ss:$0 sps:$4 sm:$0x11]   ;;  %v872_v10 = vld [vmem:[#allocation3] sm:$0xff] }
 0x1c8   : > { %v808_v12 = vrot.slane %v807_v11, 4 }
 0x1ca   : > { %v809_v13 = vmax.f32 %v807_v11, %v808_v12  ;;  %v874_v11 = vld [vmem:[#allocation3 + $0x10] sm:$0xff]  ;;  %v873_v12 = vld [vmem:[#allocation3 + $0x8] sm:$0xff] }
 0x1cc   : > { %v810_v15 = vrot.slane %v809_v13, 2 }
 0x1ce   : > { %v811_v16 = vmax.f32 %v809_v13, %v810_v15  ;;  %v875_v13 = vld [vmem:[#allocation3 + $0x18] sm:$0xff] }
 0x1d0   : > { %v812_v18 = vrot.slane %v811_v16, 1 }
 0x1d2   : > { %v813_v20 = vmax.f32 %v811_v16, %v812_v18 }
 0x1d4   : > { %v814_v22 = vmax.f32 %v792_v19, %v813_v20 }
 0x1d6   : > { %v815_v23 = vsub.f32 %v792_v19, %v814_v22  ;;  %v822_v24 = vrot.slane %v814_v22, %v1964_v21  ;;  %1023 = vst [vmem:[#allocation2] sm:$0x1] %v814_v22 }
 0x1d8   : > { %v816_v25 = vmul.f32 1.442695, %v815_v23  ;;  %v836_v26 = vsub.f32 %v777_v3, %v822_v24  ;;  %v837_v27 = vsub.f32 %v780_v7, %v822_v24  ;;  %v824_v28 = vsub.f32 %v729_v46, %v822_v24  ;;  %v1628_v7 = vld [vmem:[%s1943_s23 + $0x10] sm:$0xff]  }
 0x1d9   : > { %v825_v29 = vsub.f32 %v732_v48, %v822_v24  ;;  %v826_v30 = vsub.f32 %v1457_v45, %v822_v24  ;;  %v827_v31 = vsub.f32 %v1458_v47, %v822_v24  ;;  %v828_v32 = vsub.f32 %v745_v51, %v822_v24 }
 0x1da   : > { %1631 = vpow2.f32 %v816_v25  ;;  %v846_v33 = vpack.c.bf16 %v837_v27, %v836_v26  ;;  %v829_v34 = vsub.f32 %v748_v55, %v822_v24  ;;  %v830_v35 = vsub.f32 %v1461_v49, %v822_v24 }
 0x1db   : > { %v840_v36 = vpack.c.bf16 %v825_v29, %v824_v28  ;;  %v841_v37 = vpack.c.bf16 %v827_v31, %v826_v30  ;;  %v831_v38 = vsub.f32 %v1462_v53, %v822_v24  ;;  %v832_v39 = vsub.f32 %v761_v59, %v822_v24  ;;  %v876_v30 = vld [vmem:[#allocation3 + $0x20] sm:$0xff]  ;;  %v877_v31 = vld [vmem:[#allocation3 + $0x28] sm:$0xff] }
 0x1dc   : > { %v842_v40 = vpack.c.bf16 %v829_v34, %v828_v32  ;;  %v833_v41 = vsub.f32 %v764_v63, %v822_v24  ;;  %v834_v42 = vsub.f32 %v1465_v57, %v822_v24  ;;  %v835_v52 = vsub.f32 %v1466_v61, %v822_v24 }
 0x1dd   : > { %v849_v43 = vmul.bf16 1069105081, %v840_v36  ;;  %v843_v50 = vpack.c.bf16 %v831_v38, %v830_v35  ;;  %v838_v46 = vsub.f32 %v1469_v1, %v822_v24  ;;  %v852_v45 = vmul.bf16 1069105081, %v841_v37 }
 0x1de   : > { %v844_v54 = vpack.c.bf16 %v833_v41, %v832_v39  ;;  %v845_v47 = vpack.c.bf16 %v835_v52, %v834_v42  ;;  %v839_v48 = vsub.f32 %v1470_v5, %v822_v24  ;;  %v855_v55 = vmul.bf16 1069105081, %v842_v40  ;;  %v1626_v5 = vld [vmem:[%s1943_s23] sm:$0xff]  }
 0x1df   : > { %1633 = vpow.bf16 %v849_v43  ;;  %v858_v53 = vmul.bf16 1069105081, %v843_v50  ;;  %v867_v62 = vmul.bf16 1069105081, %v846_v33  ;;  %v878_v40 = vld [vmem:[#allocation3 + $0x30] sm:$0xff]  ;;  %v879_v41 = vld [vmem:[#allocation3 + $0x38] sm:$0xff] }
 0x1e0   : > { %v847_v51 = vpack.c.bf16 %v839_v48, %v838_v46  ;;  %1635 = vpow.bf16 %v852_v45  ;;  %v861_v57 = vmul.bf16 1069105081, %v844_v54  ;;  %v864_v60 = vmul.bf16 1069105081, %v845_v47  ;;  %v880_v48 = vld [vmem:[#allocation3 + $0x40] sm:$0x1] }
 0x1e1   : > { %1637 = vpow.bf16 %v855_v55 }
 0x1e2   : > { %1639 = vpow.bf16 %v858_v53  ;;  %v870_v0 = vmul.bf16 1069105081, %v847_v51 }
 0x1e3   : > { %1641 = vpow.bf16 %v861_v57 }
 0x1e4   : > { %v1632_v49 = vpop.eup %1631  ;;  %1643 = vpow.bf16 %v864_v60  ;;  %v1095_v60 = vld [vmem:[%s1936_s13] sm:$0xff] (!%p1417_p4) }
 0x1e5   : > { %v1968_v56 = vrot.slane %v1632_v49, %v1964_v21  ;;  %1645 = vpow.bf16 %v867_v62  ;;  %v1096_v62 = vld [vmem:[%s1936_s13 + $0x8] sm:$0xff] (!%p1417_p4) }
 0x1e6   : > { %1647 = vpow.bf16 %v870_v0  ;;  %v1123_v0 = vld [vmem:[%s1941_s0] sm:$0xff] (!%p1417_p4) }
 0x1e7   : > { %v887_v14 = vmul.f32 %v1968_v56, %v872_v10  ;;  %v889_v15 = vmul.f32 %v1968_v56, %v874_v11  ;;  %v888_v23 = vmul.f32 %v1968_v56, %v873_v12  ;;  %v891_v32 = vmul.f32 %v1968_v56, %v876_v30 }
 0x1e8   : > { %v892_v36 = vmul.f32 %v1968_v56, %v877_v31  ;;  %v893_v42 = vmul.f32 %v1968_v56, %v878_v40  ;;  %v894_v54 = vmul.f32 %v1968_v56, %v879_v41  ;;  %v895_v51 = vmul.f32 %v1968_v56, %v880_v48  ;;  %v1091_v41 = vld [vmem:[%s1945_s21] sm:$0xff] (!%p1417_p4) }
 0x1ea   : > { %v1634_v58 = vpop.eup %1633 }
 0x1eb   : > { %1472 = vmatpush3.bf16.msra.mxu0 %v1634_v58  ;;  %1515 = vmatpush3.bf16.msra.mxu1 %v1634_v58  ;;  %v1636_v59 = vpop.eup %1635 }
 0x1ec   : > { %1473 = vmatprep.subr.bf16.mxu0 %v1752_v44  ;;  %1508 = vmatprep.subr.bf16.mxu1 %v1752_v44  ;;  %v1638_v61 = vpop.eup %1637 }
 0x1ed   : > { %v1640_v63 = vpop.eup %1639 }
 0x1ee   : > { %v1642_v1 = vpop.eup %1641 }
 0x1ef   : > { %1474 = vmatpush3.bf16.msra.mxu0 %v1636_v59  ;;  %1516 = vmatpush3.bf16.msra.mxu1 %v1636_v59  ;;  %v1644_v2 = vpop.eup %1643  ;;  %v1097_v59 = vld [vmem:[%s1936_s13 + $0x10] sm:$0xff] (!%p1417_p4) }
 0x1f0   : > { %1475 = vmatprep.subr.bf16.mxu0 %v1752_v44  ;;  %1509 = vmatprep.subr.bf16.mxu1 %v1752_v44  ;;  %v1646_v3 = vpop.eup %1645 }
 0x1f1   : > { %v1648_v4 = vpop.eup %1647 }
 0x1f3   : > { %1476 = vmatpush3.bf16.msra.mxu0 %v1638_v61  ;;  %1517 = vmatpush3.bf16.msra.mxu1 %v1638_v61  ;;  %v1098_v61 = vld [vmem:[%s1936_s13 + $0x18] sm:$0xff] (!%p1417_p4) }
 0x1f4   : > { %1477 = vmatprep.subr.bf16.mxu0 %v1752_v44  ;;  %1510 = vmatprep.subr.bf16.mxu1 %v1752_v44 }
 0x1f7   : > { %1478 = vmatpush3.bf16.msra.mxu0 %v1640_v63  ;;  %1518 = vmatpush3.bf16.msra.mxu1 %v1640_v63  ;;  %v1124_v63 = vld [vmem:[%s1941_s0 + $0x8] sm:$0xff] (!%p1417_p4) }
 0x1f8   : > { %1479 = vmatprep.subr.bf16.mxu0 %v1752_v44  ;;  %1511 = vmatprep.subr.bf16.mxu1 %v1752_v44 }
 0x1fb   : > { %1480 = vmatpush3.bf16.msra.mxu0 %v1642_v1  ;;  %1519 = vmatpush3.bf16.msra.mxu1 %v1642_v1  ;;  %v1126_v1 = vld [vmem:[%s1941_s0 + $0x18] sm:$0xff] (!%p1417_p4) }
 0x1fc   : > { %1481 = vmatprep.subr.bf16.mxu0 %v1752_v44  ;;  %1512 = vmatprep.subr.bf16.mxu1 %v1752_v44 }
 0x1ff   : > { %1482 = vmatpush3.bf16.msra.mxu0 %v1644_v2  ;;  %1520 = vmatpush3.bf16.msra.mxu1 %v1644_v2  ;;  %v1125_v2 = vld [vmem:[%s1941_s0 + $0x10] sm:$0xff] (!%p1417_p4) }
 0x200   : > { %1483 = vmatprep.subr.bf16.mxu0 %v1752_v44  ;;  %1513 = vmatprep.subr.bf16.mxu1 %v1752_v44 }
 0x203   : > { %1484 = vmatpush3.bf16.msra.mxu0 %v1646_v3  ;;  %1521 = vmatpush3.bf16.msra.mxu1 %v1646_v3 }
 0x204   : > { %1485 = vmatprep.subr.bf16.mxu0 %v1752_v44  ;;  %1514 = vmatprep.subr.bf16.mxu1 %v1752_v44 }
 0x207   : > { %1486 = vmatpush3.bf16.msra.mxu0 %v1648_v4  ;;  %1522 = vmatpush3.bf16.msra.mxu1 %v1648_v4 }
 0x20a   : > { %1488 = vmatmul.mubr.bf16.vlgmr.msra.gmra.mrb[16].mxu0 %v1626_v5  ;;  %1492 = vmatmul.mubr.bf16.vlgmr.msra.gmra.mrb[0].mxu1 %v1627_v6 }
 0x20b   : > { %1495 = vmatprep.mubr.msk.bf16.mxu1 %vm1753_vm2, %v1752_v44 }
 0x212   : > { %1496 = vmatmul.mubr.bf16.gmra.mrb[4].mxu1 %v1628_v7 }
 0x213   : > { %1499 = vmatprep.mubr.msk.bf16.mxu1 %vm1753_vm2, %v1752_v44 }
 0x21a   : > { %1500 = vmatmul.mubr.bf16.gmra.mrb[8].mxu1 %v1629_v8 }
 0x21b   : > { %1503 = vmatprep.mubr.msk.bf16.mxu1 %vm1753_vm2, %v1752_v44  ;;  %v890_v44 = vmul.f32 %v1968_v56, %v875_v13  ;;  %v1754_v56 = vmov (!%p1417_p4), 0  }
 0x21c   : > { %1650 = vset.pattern.permute.xlu1 (!%p1417_p4), %v1754_v56  ;;  %1649 = vset.pattern.permute.xlu0 (!%p1417_p4), %v1754_v56 }
 0x21d   : > { %1111 = vperm.xlu1 (!%p1417_p4), %1650, %v1097_v59   ;;  %1101 = vperm.xlu0 (!%p1417_p4), %1649, %v1095_v60  }
 0x221   : > { %1116 = vperm.xlu1 (!%p1417_p4), %1650, %v1098_v61   ;;  %1106 = vperm.xlu0 (!%p1417_p4), %1649, %v1096_v62  }
 0x222   : > { %1504 = vmatmul.mubr.bf16.gmra.mrb[12].mxu1 %v1630_v9 }
 0x225   : > { %1134 = vperm.xlu1 (!%p1417_p4), %1650, %v1124_v63   ;;  %1129 = vperm.xlu0 (!%p1417_p4), %1649, %v1123_v0  }
 0x229   : > { %1144 = vperm.xlu1 (!%p1417_p4), %1650, %v1126_v1   ;;  %1139 = vperm.xlu0 (!%p1417_p4), %1649, %v1125_v2  }
 0x2dd   : > { %v967_v16 = vpop.f32.mrb[16].mxu0  ;;  %v975_v17 = vpop.f32.mrb[0].mxu1 }
 0x2de   : > { %v1005_v18 = vadd.f32 %v967_v16, %v887_v14  ;;  %v1007_v19 = vadd.f32 %v975_v17, %v889_v15  ;;  %v1489_v20 = vpop.f32.mrb[17].mxu0  ;;  %v1493_v22 = vpop.f32.mrb[1].mxu1 }
 0x2df   : > { %v970_v24 = vpop.f32.mrb[18].mxu0  ;;  %v978_v25 = vpop.f32.mrb[2].mxu1 }
 0x2e0   : > { %1014 = vst [vmem:[#allocation3] sm:$0xff] %v1005_v18  ;;  %1016 = vst [vmem:[#allocation3 + $0x10] sm:$0xff] %v1007_v19  ;;  %v1006_v26 = vadd.f32 %v970_v24, %v888_v23  ;;  %v1008_v27 = vadd.f32 %v978_v25, %v890_v44  ;;  %v1494_v28 = vpop.f32.mrb[3].mxu1  ;;  %v1490_v29 = vpop.f32.mrb[19].mxu0 }
 0x2e2   : > { %1015 = vst [vmem:[#allocation3 + $0x8] sm:$0xff] %v1006_v26  ;;  %1017 = vst [vmem:[#allocation3 + $0x18] sm:$0xff] %v1008_v27 }
 0x2e5   : > { %v983_v33 = vpop.f32.mrb[4].mxu1 }
 0x2e6   : > { %v1009_v34 = vadd.f32 %v983_v33, %v891_v32  ;;  %v1497_v35 = vpop.f32.mrb[5].mxu1 }
 0x2e7   : > { %v986_v37 = vpop.f32.mrb[6].mxu1  ;;  %v1028_v7 = vld [vmem:[#allocation3] sm:$0xff] (!%p1417_p4)  ;;  %v1030_v13 = vld [vmem:[#allocation3 + $0x10] sm:$0xff] (!%p1417_p4)  ;;  %v1112_v35 = vpop.permute.xlu1 (!%p1417_p4), %1111 }
 0x2e8   : > { %1018 = vst [vmem:[#allocation3 + $0x20] sm:$0xff] %v1009_v34  ;;  %v1010_v38 = vadd.f32 %v986_v37, %v892_v36  ;;  %v1498_v39 = vpop.f32.mrb[7].mxu1  ;;  %v1102_v36 = vpop.permute.xlu0 (!%p1417_p4), %1101 }
 0x2e9   : > { %v1029_v6 = vld [vmem:[#allocation3 + $0x8] sm:$0xff] (!%p1417_p4)  ;;  %v1031_v11 = vld [vmem:[#allocation3 + $0x18] sm:$0xff] (!%p1417_p4) }
 0x2ea   : > { %1019 = vst [vmem:[#allocation3 + $0x28] sm:$0xff] %v1010_v38 }
 0x2ed   : > { %v991_v43 = vpop.f32.mrb[8].mxu1 }
 0x2ee   : > { %v1011_v50 = vadd.f32 %v991_v43, %v893_v42  ;;  %v1501_v52 = vpop.f32.mrb[9].mxu1  ;;  %v1117_v42 = vpop.permute.xlu1 (!%p1417_p4), %1116 }
 0x2ef   : > { %v994_v46 = vpop.f32.mrb[10].mxu1  ;;  %v1032_v12 = vld [vmem:[#allocation3 + $0x20] sm:$0xff] (!%p1417_p4)  ;;  %v1107_v43 = vpop.permute.xlu0 (!%p1417_p4), %1106 }
 0x2f0   : > { %1020 = vst [vmem:[#allocation3 + $0x30] sm:$0xff] %v1011_v50  ;;  %v1012_v45 = vadd.f32 %v994_v46, %v894_v54  ;;  %v1502_v47 = vpop.f32.mrb[11].mxu1  ;;  %v1092_v50 = vld [vmem:[%s1945_s21 + $0x8] sm:$0xff] (!%p1417_p4) }
 0x2f1   : > { %v1033_v9 = vld [vmem:[#allocation3 + $0x28] sm:$0xff] (!%p1417_p4) }
 0x2f2   : > { %1021 = vst [vmem:[#allocation3 + $0x38] sm:$0xff] %v1012_v45  ;;  %1027 = sbr.rel (%p1417_p4) target bundleno = 812 (0x32c), region = 210 }
 0x2f3   : > { %v1130_v60 = vpop.permute.xlu0 (!%p1417_p4), %1129 }
 0x2f5   : > { %v999_v55 = vpop.f32.mrb[12].mxu1 }
 0x2f6   : > { %v1013_v49 = vadd.f32 %v999_v55, %v895_v51  ;;  %v1505_v53 = vpop.f32.mrb[13].mxu1  ;;  %v1119_v51 = vsub.f32 (!%p1417_p4), %v1091_v41, %v1102_v36  ;;  %v1120_v55 = vsub.f32 (!%p1417_p4), %v1092_v50, %v1107_v43 }
 0x2f7   : > { %v1002_v58 = vpop.f32.mrb[14].mxu1  ;;  %v1034_v20 = vld [vmem:[#allocation3 + $0x30] sm:$0xff] (!%p1417_p4)  ;;  %v1093_v53 = vld [vmem:[%s1945_s21 + $0x10] sm:$0xff] (!%p1417_p4) }
 0x2f8   : > { %1022 = vst [vmem:[#allocation3 + $0x40] sm:$0x1] %v1013_v49  ;;  %v1506_v57 = vpop.f32.mrb[15].mxu1  ;;  %v1094_v58 = vld [vmem:[%s1945_s21 + $0x18] sm:$0xff] (!%p1417_p4)  ;;  %v1147_v63 = vmul.f32 (!%p1417_p4), %v1130_v60, %v1119_v51  ;;  %v1121_v2 = vsub.f32 (!%p1417_p4), %v1093_v53, %v1112_v35 }
 0x2f9   : > { %v1035_v18 = vld [vmem:[#allocation3 + $0x38] sm:$0xff]  ;;  %v1135_v57 = vpop.permute.xlu1 %1134 }
 0x2fa   : > { %v1148_v62 = vmul.f32 %v1135_v57, %v1120_v55 }
 0x2ff   : > { %v1036_v3 = vld [vmem:[#allocation3 + $0x40] sm:$0x1] }
 0x300   : > { %1651 = vrcp.f32 %v1036_v3  ;;  %v1122_v3 = vsub.f32 %v1094_v58, %v1117_v42 }
 0x30a   : > { %v1652_v4 = vpop.eup %1651 }
 0x30b   : > { %v1042_v5 = vrot.slane %v1652_v4, %v1964_v21 }
 0x30d   : > { %v2014_v8 = vmul.f32 %v1042_v5, %v1029_v6  ;;  %v2016_v10 = vmul.f32 %v1042_v5, %v1028_v7  ;;  %v1048_v14 = vmul.f32 %v1042_v5, %v1033_v9  ;;  %v2020_v16 = vmul.f32 %v1042_v5, %v1031_v11  ;;  %v1145_v6 = vpop.permute.xlu1 %1144  ;;  %v1140_v9 = vpop.permute.xlu0 %1139 }
 0x30e   : > { %v1047_v17 = vmul.f32 %v1042_v5, %v1032_v12  ;;  %v2024_v19 = vmul.f32 %v1042_v5, %v1030_v13  ;;  %v1050_v23 = vmul.f32 %v1042_v5, %v1035_v18  ;;  %v1049_v25 = vmul.f32 %v1042_v5, %v1034_v20 }
 0x30f   : > { %v1052_v15 = vmul.f32 %v2014_v8, %v2014_v8  ;;  %v1051_v21 = vmul.f32 %v2016_v10, %v2016_v10  ;;  %v1054_v44 = vmul.f32 %v2020_v16, %v2020_v16 }
 0x310   : > { %v1053_v26 = vmul.f32 %v2024_v19, %v2024_v19 }
 0x311   : > { %v1056_v22 = vsub.f32 %v1048_v14, %v1052_v15  ;;  %v1055_v24 = vsub.f32 %v1047_v17, %v1051_v21  ;;  %v1058_v28 = vsub.f32 %v1050_v23, %v1054_v44  ;;  %v1150_v14 = vmul.f32 %v1145_v6, %v1122_v3 }
 0x312   : > { %v1057_v30 = vsub.f32 %v1049_v25, %v1053_v26  ;;  %v1149_v15 = vmul.f32 %v1140_v9, %v1121_v2 }
 0x313   : > { %v1060_v27 = vmax.f32 %v1056_v22, 0.0  ;;  %v1059_v29 = vmax.f32 %v1055_v24, 0.0  ;;  %v1062_v31 = vmax.f32 %v1058_v28, 0.0 }
 0x314   : > { %v1061_v32 = vmax.f32 %v1057_v30, 0.0 }
 0x315   : > { %1653 = vrsqrt.f32 %v1060_v27  ;;  %vm1072_vm3 = vcmp.eq.f32.partialorder %v1060_v27, inf  ;;  %vm1065_vm4 = vcmp.eq.f32.partialorder %v1059_v29, inf  ;;  %vm1074_vm5 = vcmp.eq.f32.partialorder %v1060_v27, 0.0 }
 0x316   : > { %1655 = vrsqrt.f32 %v1059_v29  ;;  %v1075_v52 = vand.u32 2147483648, %v1060_v27  ;;  %vm1067_vm6 = vcmp.eq.f32.partialorder %v1059_v29, 0.0  ;;  %v1068_v54 = vand.u32 2147483648, %v1059_v29 }
 0x317   : > { %1657 = vrsqrt.f32 %v1062_v31  ;;  %vm1086_vm7 = vcmp.eq.f32.partialorder %v1062_v31, inf  ;;  %vm1079_vm8 = vcmp.eq.f32.partialorder %v1061_v32, inf  ;;  %vm1088_vm9 = vcmp.eq.f32.partialorder %v1062_v31, 0.0 }
 0x318   : > { %1659 = vrsqrt.f32 %v1061_v32  ;;  %v1089_v49 = vand.u32 2147483648, %v1062_v31  ;;  %vm1081_vm10 = vcmp.eq.f32.partialorder %v1061_v32, 0.0  ;;  %v1082_v61 = vand.u32 2147483648, %v1061_v32 }
 0x31f   : > { %v1654_v33 = vpop.eup %1653 }
 0x320   : > { %v1656_v34 = vpop.eup %1655  ;;  %v1071_v38 = vmul.f32 %v1654_v33, %v1060_v27 }
 0x321   : > { %v1658_v37 = vpop.eup %1657  ;;  %v1064_v39 = vmul.f32 %v1656_v34, %v1059_v29 }
 0x322   : > { %v1660_v40 = vpop.eup %1659  ;;  %v1073_v46 = vsel %vm1072_vm3, %v1060_v27, %v1071_v38  ;;  %v1085_v47 = vmul.f32 %v1658_v37, %v1062_v31 }
 0x323   : > { %v1066_v45 = vsel %vm1065_vm4, %v1059_v29, %v1064_v39  ;;  %v1078_v48 = vmul.f32 %v1660_v40, %v1061_v32  ;;  %v1076_v59 = vsel %vm1074_vm5, %v1075_v52, %v1073_v46 }
 0x324   : > { %v1069_v56 = vsel %vm1067_vm6, %v1068_v54, %v1066_v45  ;;  %v1087_v0 = vsel %vm1086_vm7, %v1062_v31, %v1085_v47  ;;  %v1152_v4 = vmul.f32 %v1148_v62, %v1076_v59 }
 0x325   : > { %v1080_v1 = vsel %vm1079_vm8, %v1061_v32, %v1078_v48  ;;  %v1151_v5 = vmul.f32 %v1147_v63, %v1069_v56  ;;  %v1090_v7 = vsel %vm1088_vm9, %v1089_v49, %v1087_v0 }
 0x326   : > { %v1083_v11 = vsel %vm1081_vm10, %v1082_v61, %v1080_v1  ;;  %v1156_v12 = vadd.f32 %v1152_v4, %v2014_v8  ;;  %v1154_v17 = vmul.f32 %v1150_v14, %v1090_v7 }
 0x327   : > { %v1155_v13 = vadd.f32 %v1151_v5, %v2016_v10  ;;  %v1153_v21 = vmul.f32 %v1149_v15, %v1083_v11 }
 0x328   : > { %1160 = vst [vmem:[%s1947_s12 + $0x8] sm:$0xff] %v1156_v12  ;;  %v1158_v18 = vadd.f32 %v1154_v17, %v2020_v16 }
 0x329   : > { %1159 = vst [vmem:[%s1947_s12] sm:$0xff] %v1155_v13  ;;  %v1157_v20 = vadd.f32 %v1153_v21, %v2024_v19 }
 0x32a   : > { %1162 = vst [vmem:[%s1947_s12 + $0x18] sm:$0xff] %v1158_v18 }
 0x32b   : > { %1161 = vst [vmem:[%s1947_s12 + $0x10] sm:$0xff] %v1157_v20 }
 0x32c PF: > { %1169 = sbr.rel (!%p1881_p9) target bundleno = 823 (0x337), region = 214  ;;  %s2115_s0 = sld [smem:[#allocation9_spill]] (%p1881_p9) }
 0x32d   : > { %s1419_s1 = sshll.u32 (%p1881_p9), %s1731_s27, 3  ;;  %s2116_s15 = sld [smem:[#allocation16_spill]] (%p1881_p9) }
 0x32f   : > { %v1209_v10 = vld [vmem:[%s1947_s12 + $0x8] sm:$0xff] (%p1881_p9) }
 0x330   : > { %v1207_v8 = vld [vmem:[%s1947_s12] sm:$0xff] (%p1881_p9) }
 0x331   : > { %v1213_v16 = vld [vmem:[%s1947_s12 + $0x18] sm:$0xff] (%p1881_p9) }
 0x332   : > { %s1171_s2 = sadd.s32 (%p1881_p9), %s2115_s0, %s1419_s1  ;;  %v1211_v22 = vld [vmem:[%s1947_s12 + $0x10] sm:$0xff] (%p1881_p9) }
 0x333   : > { %s1420_s25 = sshll.u32 %s1171_s2, 3 }
 0x334   : > { %s1173_s16 = scalar_lea.vmem %s2116_s15, %s1420_s25 }
 0x335   : > { %1208 = vst [vmem:[%s1173_s16] sm:$0xff] %v1207_v8  ;;  %1210 = vst [vmem:[%s1173_s16 + $0x10] sm:$0xff] %v1209_v10 }
 0x336   : > { %1212 = vst [vmem:[%s1173_s16 + $0x20] sm:$0xff] %v1211_v22  ;;  %1214 = vst [vmem:[%s1173_s16 + $0x30] sm:$0xff] %v1213_v16 }
 0x337 PF: > { %s16_s7 = sadd.s32 1, %s1747_s7   ;;  %s2117_s17 = sld [smem:[#allocation10_spill]] }
 0x338   : > { %p13_p5 = scmp.ge.s32.totalorder %s16_s7, 10   ;;  %s2118_s19 = sld [smem:[#allocation11_spill]] }
 0x339   : > { %s2119_s6 = sld [smem:[#allocation12_spill]]  ;;  %s2120_s21 = smov %s1711_s22 }
 0x33a   : > { %s2121_s22 = smov %s1892_s9  ;;  %s2122_s23 = smov %s1719_s24 }
 0x33b   : > { %s2123_s24 = smov %s1889_s11  ;;  %s2124_s25 = smov %s1735_s28 }
 0x33c   : > { %s2125_s26 = smov %s1739_s29  ;;  %s2126_s27 = smov %s1743_s30 }
 0x33d   : > { %s2127_s28 = smov %s2117_s17  ;;  %15 = sbr.rel (!%p13_p5) target bundleno = 11 (0xb), region = 313 }
 0x33e   : > { %s2128_s29 = smov %s2118_s19 }
 0x33f   : > { %s2129_s30 = smov %s2119_s6 }

</bundles_post_ra>
